<compile_context>
chip_gen: v7x
topology: tpu7x:2x2x1
jax: 0.10.0
libtpu: 0.0.40
codegen_flags: <defaults>
</compile_context>

<pallas_src>
import math

import jax
import jax.numpy as jnp
from jax import lax
from jax.experimental import pallas as pl
from jax.experimental.pallas import tpu as pltpu

# ---- config (small, consistent with the module) ----
N_EMBD = 32
N_HEAD = 4
BLOCK_SIZE = 8                # max sequence length (causal mask size)
HEAD_DIM = N_EMBD // N_HEAD
LN_EPS = 1e-5                 # torch.nn.LayerNorm default eps
TARGET_ROWS = 1024            # rows (= sequences * T) per grid step


def _layernorm(h, gamma, beta):
    mu = jnp.mean(h, axis=-1, keepdims=True)
    var = jnp.mean((h - mu) ** 2, axis=-1, keepdims=True)
    return (h - mu) * lax.rsqrt(var + LN_EPS) * gamma + beta


def _gelu_tanh(x):
    # nn.GELU(approximate='tanh')
    c = 0.7978845608028654  # sqrt(2/pi)
    return 0.5 * x * (1.0 + jnp.tanh(c * (x + 0.044715 * x * x * x)))


def block_kernel(x_ref, mask_ref,
                 ln1g_ref, ln1b_ref,
                 wqkv_ref, bqkv_ref,
                 wpa_ref, bpa_ref,
                 ln2g_ref, ln2b_ref,
                 wfc_ref, bfc_ref,
                 wpm_ref, bpm_ref,
                 o_ref,
                 stage_ref):
    Bb = x_ref.shape[0]
    C = N_EMBD
    T = x_ref.shape[1] // C
    BT = Bb * T
    H, D = N_HEAD, HEAD_DIM
    mm_dt = wqkv_ref.dtype                      # matmul operand dtype (f32 or bf16)

    # ---- lane-dense (Bb, T*C) -> row-major (Bb*T, C) via VMEM staging ----
    # Scatter the T per-token 32-lane chunks of each lane-dense row into the
    # (Bb, T, C) scratch, then read it back as a b-major row slab.
    for t in range(T):
        stage_ref[:, t, :] = x_ref[:, t * C:(t + 1) * C]
    x = stage_ref[...].reshape(BT, C)           # f32 residual rows

    # ---------------- attention branch: attn(ln_1(x)) ----------------
    h1 = _layernorm(x, ln1g_ref[...], ln1b_ref[...])
    # 1/sqrt(head_dim) is already folded into the q columns of wqkv/bqkv.
    qkv = jnp.dot(h1.astype(mm_dt), wqkv_ref[...],
                  preferred_element_type=jnp.float32) + bqkv_ref[...]     # (BT, 3C)
    q3 = qkv[:, 0 * C:1 * C].reshape(Bb, T, C)
    k3 = qkv[:, 1 * C:2 * C].reshape(Bb, T, C)
    v3 = qkv[:, 2 * C:3 * C].reshape(Bb, T, C)

    # Merge heads into the batch dim: (Bb, T, C) -> (H*Bb, T, D), head-major.
    def split_heads(a):
        return jnp.concatenate(
            [a[:, :, h * D:(h + 1) * D] for h in range(H)], axis=0)

    qh = split_heads(q3).astype(mm_dt)
    kh = split_heads(k3).astype(mm_dt)
    vh = split_heads(v3).astype(mm_dt)

    s = jnp.einsum("btd,bsd->bts", qh, kh,
                   preferred_element_type=jnp.float32)                    # (H*Bb, T, T)
    s = s + mask_ref[...]                         # additive causal mask (0 / -1e30)
    s = s - jnp.max(s, axis=-1, keepdims=True)
    pr = jnp.exp(s)
    pr = pr * pl.reciprocal(jnp.sum(pr, axis=-1, keepdims=True), approx=True)
    oh = jnp.einsum("bts,bsd->btd", pr.astype(mm_dt), vh,
                    preferred_element_type=jnp.float32)                   # (H*Bb, T, D)

    # Heads back onto lanes and a single K=32 output projection matmul.
    y = jnp.concatenate(
        [oh[h * Bb:(h + 1) * Bb].reshape(BT, D) for h in range(H)], axis=-1)
    y = jnp.dot(y.astype(mm_dt), wpa_ref[...],
                preferred_element_type=jnp.float32) + bpa_ref[...]
    x1 = x + y                                    # first residual (f32)

    # ---------------- MLP branch: mlp(ln_2(x)) ----------------
    h2 = _layernorm(x1, ln2g_ref[...], ln2b_ref[...])
    f = jnp.dot(h2.astype(mm_dt), wfc_ref[...],
                preferred_element_type=jnp.float32) + bfc_ref[...]        # (BT, 4C)
    g = _gelu_tanh(f)                             # element-wise math stays f32
    m = jnp.dot(g.astype(mm_dt), wpm_ref[...],
                preferred_element_type=jnp.float32) + bpm_ref[...]        # (BT, C)

    # ---- row-major -> lane-dense; one dense 256-lane store ----
    stage_ref[...] = (x1 + m).reshape(Bb, T, C)
    o_ref[...] = jnp.concatenate(
        [stage_ref[:, t, :] for t in range(T)], axis=-1)                  # (Bb, T*C)


def init_params(key, n_embd=N_EMBD):
    """Deterministic synthetic parameters (PyTorch nn.Linear layout: (out, in))."""
    ks = jax.random.split(key, 6)
    s = 0.02
    return {
        "ln1_g": jnp.ones((n_embd,), jnp.float32),
        "ln1_b": jnp.zeros((n_embd,), jnp.float32),
        "w_attn": jax.random.normal(ks[0], (3 * n_embd, n_embd), jnp.float32) * s,
        "b_attn": jax.random.normal(ks[1], (3 * n_embd,), jnp.float32) * s,
        "w_proj_attn": jax.random.normal(ks[2], (n_embd, n_embd), jnp.float32) * s,
        "b_proj_attn": jnp.zeros((n_embd,), jnp.float32),
        "ln2_g": jnp.ones((n_embd,), jnp.float32),
        "ln2_b": jnp.zeros((n_embd,), jnp.float32),
        "w_fc": jax.random.normal(ks[3], (4 * n_embd, n_embd), jnp.float32) * s,
        "b_fc": jax.random.normal(ks[4], (4 * n_embd,), jnp.float32) * s,
        "w_proj_mlp": jax.random.normal(ks[5], (n_embd, 4 * n_embd), jnp.float32) * s,
        "b_proj_mlp": jnp.zeros((n_embd,), jnp.float32),
    }


def prepare_params(p, matmul_dtype=jnp.float32):
    """One-time (per set of weights) prep hoisted out of the hot path:
    transpose nn.Linear weights to (in, out), fold 1/sqrt(head_dim) into the
    q rows of the QKV projection, reshape biases / LN params to (1, dim), and
    optionally cast matmul weights to bf16 (v6e/v7x throughput path)."""
    C = N_EMBD
    wd = matmul_dtype
    scale = 1.0 / math.sqrt(HEAD_DIM)
    qkv_scale = jnp.concatenate([jnp.full((C,), scale, jnp.float32),
                                 jnp.ones((2 * C,), jnp.float32)])
    return {
        "ln1_g": p["ln1_g"][None, :].astype(jnp.float32),
        "ln1_b": p["ln1_b"][None, :].astype(jnp.float32),
        "w_qkv": (p["w_attn"].T * qkv_scale[None, :]).astype(wd),
        "b_qkv": (p["b_attn"] * qkv_scale)[None, :].astype(jnp.float32),
        "w_pa": p["w_proj_attn"].T.astype(wd),
        "b_pa": p["b_proj_attn"][None, :].astype(jnp.float32),
        "ln2_g": p["ln2_g"][None, :].astype(jnp.float32),
        "ln2_b": p["ln2_b"][None, :].astype(jnp.float32),
        "w_fc": p["w_fc"].T.astype(wd),
        "b_fc": p["b_fc"][None, :].astype(jnp.float32),
        "w_pm": p["w_proj_mlp"].T.astype(wd),
        "b_pm": p["b_proj_mlp"][None, :].astype(jnp.float32),
    }


def block_forward(x, prepped):
    B, T, C = x.shape
    assert C == N_EMBD, "n_embd mismatch"
    assert (T * C) % 128 == 0, "T*C must be a multiple of 128 for lane-dense I/O"

    # Batch-block sizing: amortize per-step pipeline overhead (>=TARGET_ROWS
    # rows), keep >=2 grid steps when the batch allows it (v7x has 2 TCs), and
    # keep the second-minor block dim 8-aligned (or equal to the full dim).
    b_blk = max(1, TARGET_ROWS // T)
    b_blk = min(b_blk, B)
    if B >= 16:
        b_blk = min(b_blk, pl.cdiv(B, 2))
    if b_blk < B:
        b_blk = max(8, (b_blk // 8) * 8)
    if b_blk >= B:
        b_blk, nblk, B_pad = B, 1, B
    else:
        nblk = pl.cdiv(B, b_blk)
        B_pad = nblk * b_blk

    # Lane-dense residual layout: one sequence = one dense 256-lane row.
    x2 = x.reshape(B, T * C)
    if B_pad != B:
        x2 = jnp.pad(x2, ((0, B_pad - B), (0, 0)))

    # Additive causal mask (static constant for this T), passed as a tiny input.
    row = lax.broadcasted_iota(jnp.int32, (T, T), 0)
    col = lax.broadcasted_iota(jnp.int32, (T, T), 1)
    addmask = jnp.where(row >= col, 0.0, -1e30).astype(jnp.float32)

    pp = prepped
    args = (x2, addmask,
            pp["ln1_g"], pp["ln1_b"], pp["w_qkv"], pp["b_qkv"],
            pp["w_pa"], pp["b_pa"],
            pp["ln2_g"], pp["ln2_b"], pp["w_fc"], pp["b_fc"],
            pp["w_pm"], pp["b_pm"])

    in_specs = [pl.BlockSpec((b_blk, T * C), lambda i: (i, 0))]
    for a in args[1:]:
        in_specs.append(pl.BlockSpec(a.shape, lambda i: (0, 0)))

    out2 = pl.pallas_call(
        block_kernel,
        out_shape=jax.ShapeDtypeStruct((B_pad, T * C), jnp.float32),
        grid=(nblk,),
        in_specs=in_specs,
        out_specs=pl.BlockSpec((b_blk, T * C), lambda i: (i, 0)),
        scratch_shapes=[pltpu.VMEM((b_blk, T, C), jnp.float32)],
        compiler_params=pltpu.CompilerParams(
            dimension_semantics=("parallel",),
            vmem_limit_bytes=32 * 1024 * 1024),
    )(*args)
    return out2[:B].reshape(B, T, C)


# -------- pure-JAX reference (same math, for a sanity check) --------
def block_reference(x, p):
    B, T, C = x.shape

    def ln(h, g, b):
        mu = h.mean(-1, keepdims=True)
        var = ((h - mu) ** 2).mean(-1, keepdims=True)
        return (h - mu) / jnp.sqrt(var + LN_EPS) * g + b

    h = ln(x, p["ln1_g"], p["ln1_b"])
    qkv = h @ p["w_attn"].T + p["b_attn"]
    q, k, v = jnp.split(qkv, 3, axis=-1)
    q = q.reshape(B, T, N_HEAD, HEAD_DIM).transpose(0, 2, 1, 3)
    k = k.reshape(B, T, N_HEAD, HEAD_DIM).transpose(0, 2, 1, 3)
    v = v.reshape(B, T, N_HEAD, HEAD_DIM).transpose(0, 2, 1, 3)
    s = jnp.einsum("bhtd,bhsd->bhts", q, k) / math.sqrt(HEAD_DIM)
    mask = jnp.tril(jnp.ones((T, T), bool))
    s = jnp.where(mask, s, -1e30)
    a = jax.nn.softmax(s, axis=-1)
    y = jnp.einsum("bhts,bhsd->bhtd", a, v).transpose(0, 2, 1, 3).reshape(B, T, C)
    y = y @ p["w_proj_attn"].T + p["b_proj_attn"]
    x1 = x + y
    h2 = ln(x1, p["ln2_g"], p["ln2_b"])
    f = h2 @ p["w_fc"].T + p["b_fc"]
    g = 0.5 * f * (1.0 + jnp.tanh(0.7978845608028654 * (f + 0.044715 * f ** 3)))
    m = g @ p["w_proj_mlp"].T + p["b_proj_mlp"]
    return x1 + m


if __name__ == "__main__":
    key = jax.random.PRNGKey(0)
    kx, kp = jax.random.split(key)
    B, T = 2, BLOCK_SIZE
    x = jax.random.normal(kx, (B, T, N_EMBD), jnp.float32)
    params = init_params(kp)

    ref = block_reference(x, params)

    # f32 MXU operands (exact path; only the softmax reciprocal is approximate).
    out = jax.block_until_ready(block_forward(x, prepare_params(params, jnp.float32)))
    assert out.shape == (B, T, N_EMBD)
    err = float(jnp.abs(out - ref).max())
    assert jnp.allclose(out, ref, rtol=1e-3, atol=1e-3), err

    # bf16 MXU operands (v6e/v7x throughput path; f32 accumulation & element-wise).
    out_bf16 = jax.block_until_ready(
        block_forward(x, prepare_params(params, jnp.bfloat16)))
    err_bf16 = float(jnp.abs(out_bf16 - ref).max())
    assert jnp.allclose(out_bf16, ref, rtol=2e-2, atol=2e-2), err_bf16

    print("KERNEL_OK")
</pallas_src>

<mosaic_0001>
module attributes {stable_mosaic.version = 11 : i64} {
  func.func @block_kernel(%arg0: i32, %arg1: memref<2x256xf32, #tpu.memory_space<vmem>>, %arg2: memref<8x8xf32, #tpu.memory_space<vmem>>, %arg3: memref<1x32xf32, #tpu.memory_space<vmem>>, %arg4: memref<1x32xf32, #tpu.memory_space<vmem>>, %arg5: memref<32x96xf32, #tpu.memory_space<vmem>>, %arg6: memref<1x96xf32, #tpu.memory_space<vmem>>, %arg7: memref<32x32xf32, #tpu.memory_space<vmem>>, %arg8: memref<1x32xf32, #tpu.memory_space<vmem>>, %arg9: memref<1x32xf32, #tpu.memory_space<vmem>>, %arg10: memref<1x32xf32, #tpu.memory_space<vmem>>, %arg11: memref<32x128xf32, #tpu.memory_space<vmem>>, %arg12: memref<1x128xf32, #tpu.memory_space<vmem>>, %arg13: memref<128x32xf32, #tpu.memory_space<vmem>>, %arg14: memref<1x32xf32, #tpu.memory_space<vmem>>, %arg15: memref<2x256xf32, #tpu.memory_space<vmem>>, %arg16: memref<2x8x32xf32, #tpu.memory_space<vmem>>) attributes {dimension_semantics = [#tpu.dimension_semantics<parallel>], iteration_bounds = array<i64: 1>, scalar_prefetch = 0 : i64, scratch_operands = 1 : i64, tpu.core_type = #tpu.core_type<tc>, window_params = [{transform_indices = @transform_0, window_bounds = array<i64: 2, 256>}, {pipeline_mode = #tpu.pipeline_mode<synchronous>, transform_indices = @transform_1, window_bounds = array<i64: 8, 8>}, {pipeline_mode = #tpu.pipeline_mode<synchronous>, transform_indices = @transform_2, window_bounds = array<i64: 1, 32>}, {pipeline_mode = #tpu.pipeline_mode<synchronous>, transform_indices = @transform_3, window_bounds = array<i64: 1, 32>}, {pipeline_mode = #tpu.pipeline_mode<synchronous>, transform_indices = @transform_4, window_bounds = array<i64: 32, 96>}, {pipeline_mode = #tpu.pipeline_mode<synchronous>, transform_indices = @transform_5, window_bounds = array<i64: 1, 96>}, {pipeline_mode = #tpu.pipeline_mode<synchronous>, transform_indices = @transform_6, window_bounds = array<i64: 32, 32>}, {pipeline_mode = #tpu.pipeline_mode<synchronous>, transform_indices = @transform_7, window_bounds = array<i64: 1, 32>}, {pipeline_mode = #tpu.pipeline_mode<synchronous>, transform_indices = @transform_8, window_bounds = array<i64: 1, 32>}, {pipeline_mode = #tpu.pipeline_mode<synchronous>, transform_indices = @transform_9, window_bounds = array<i64: 1, 32>}, {pipeline_mode = #tpu.pipeline_mode<synchronous>, transform_indices = @transform_10, window_bounds = array<i64: 32, 128>}, {pipeline_mode = #tpu.pipeline_mode<synchronous>, transform_indices = @transform_11, window_bounds = array<i64: 1, 128>}, {pipeline_mode = #tpu.pipeline_mode<synchronous>, transform_indices = @transform_12, window_bounds = array<i64: 128, 32>}, {pipeline_mode = #tpu.pipeline_mode<synchronous>, transform_indices = @transform_13, window_bounds = array<i64: 1, 32>}, {transform_indices = @transform_14, window_bounds = array<i64: 2, 256>}]} {
    %c0 = arith.constant 0 : index
    %c0_0 = arith.constant 0 : index
    %0 = vector.load %arg1[%c0, %c0_0] : memref<2x256xf32, #tpu.memory_space<vmem>>, vector<2x32xf32>
    %c0_1 = arith.constant 0 : index
    %c0_2 = arith.constant 0 : index
    %c0_3 = arith.constant 0 : index
    %1 = vector.load %arg16[%c0_1, %c0_2, %c0_3] : memref<2x8x32xf32, #tpu.memory_space<vmem>>, vector<2x1x32xf32>
    %2 = vector.shape_cast %1 : vector<2x1x32xf32> to vector<2x32xf32>
    %3 = vector.shape_cast %0 : vector<2x32xf32> to vector<2x1x32xf32>
    tpu.vector_store %arg16[%c0_1, %c0_2, %c0_3], %3 {strides = array<i32>} : memref<2x8x32xf32, #tpu.memory_space<vmem>>, vector<2x1x32xf32>,
    %c0_4 = arith.constant 0 : index
    %c32 = arith.constant 32 : index
    %4 = vector.load %arg1[%c0_4, %c32] : memref<2x256xf32, #tpu.memory_space<vmem>>, vector<2x32xf32>
    %c0_5 = arith.constant 0 : index
    %c1 = arith.constant 1 : index
    %c0_6 = arith.constant 0 : index
    %5 = vector.load %arg16[%c0_5, %c1, %c0_6] : memref<2x8x32xf32, #tpu.memory_space<vmem>>, vector<2x1x32xf32>
    %6 = vector.shape_cast %5 : vector<2x1x32xf32> to vector<2x32xf32>
    %7 = vector.shape_cast %4 : vector<2x32xf32> to vector<2x1x32xf32>
    tpu.vector_store %arg16[%c0_5, %c1, %c0_6], %7 {strides = array<i32>} : memref<2x8x32xf32, #tpu.memory_space<vmem>>, vector<2x1x32xf32>,
    %c0_7 = arith.constant 0 : index
    %c64 = arith.constant 64 : index
    %8 = vector.load %arg1[%c0_7, %c64] : memref<2x256xf32, #tpu.memory_space<vmem>>, vector<2x32xf32>
    %c0_8 = arith.constant 0 : index
    %c2 = arith.constant 2 : index
    %c0_9 = arith.constant 0 : index
    %9 = vector.load %arg16[%c0_8, %c2, %c0_9] : memref<2x8x32xf32, #tpu.memory_space<vmem>>, vector<2x1x32xf32>
    %10 = vector.shape_cast %9 : vector<2x1x32xf32> to vector<2x32xf32>
    %11 = vector.shape_cast %8 : vector<2x32xf32> to vector<2x1x32xf32>
    tpu.vector_store %arg16[%c0_8, %c2, %c0_9], %11 {strides = array<i32>} : memref<2x8x32xf32, #tpu.memory_space<vmem>>, vector<2x1x32xf32>,
    %c0_10 = arith.constant 0 : index
    %c96 = arith.constant 96 : index
    %12 = vector.load %arg1[%c0_10, %c96] : memref<2x256xf32, #tpu.memory_space<vmem>>, vector<2x32xf32>
    %c0_11 = arith.constant 0 : index
    %c3 = arith.constant 3 : index
    %c0_12 = arith.constant 0 : index
    %13 = vector.load %arg16[%c0_11, %c3, %c0_12] : memref<2x8x32xf32, #tpu.memory_space<vmem>>, vector<2x1x32xf32>
    %14 = vector.shape_cast %13 : vector<2x1x32xf32> to vector<2x32xf32>
    %15 = vector.shape_cast %12 : vector<2x32xf32> to vector<2x1x32xf32>
    tpu.vector_store %arg16[%c0_11, %c3, %c0_12], %15 {strides = array<i32>} : memref<2x8x32xf32, #tpu.memory_space<vmem>>, vector<2x1x32xf32>,
    %c0_13 = arith.constant 0 : index
    %c128 = arith.constant 128 : index
    %16 = vector.load %arg1[%c0_13, %c128] : memref<2x256xf32, #tpu.memory_space<vmem>>, vector<2x32xf32>
    %c0_14 = arith.constant 0 : index
    %c4 = arith.constant 4 : index
    %c0_15 = arith.constant 0 : index
    %17 = vector.load %arg16[%c0_14, %c4, %c0_15] : memref<2x8x32xf32, #tpu.memory_space<vmem>>, vector<2x1x32xf32>
    %18 = vector.shape_cast %17 : vector<2x1x32xf32> to vector<2x32xf32>
    %19 = vector.shape_cast %16 : vector<2x32xf32> to vector<2x1x32xf32>
    tpu.vector_store %arg16[%c0_14, %c4, %c0_15], %19 {strides = array<i32>} : memref<2x8x32xf32, #tpu.memory_space<vmem>>, vector<2x1x32xf32>,
    %c0_16 = arith.constant 0 : index
    %c160 = arith.constant 160 : index
    %20 = vector.load %arg1[%c0_16, %c160] : memref<2x256xf32, #tpu.memory_space<vmem>>, vector<2x32xf32>
    %c0_17 = arith.constant 0 : index
    %c5 = arith.constant 5 : index
    %c0_18 = arith.constant 0 : index
    %21 = vector.load %arg16[%c0_17, %c5, %c0_18] : memref<2x8x32xf32, #tpu.memory_space<vmem>>, vector<2x1x32xf32>
    %22 = vector.shape_cast %21 : vector<2x1x32xf32> to vector<2x32xf32>
    %23 = vector.shape_cast %20 : vector<2x32xf32> to vector<2x1x32xf32>
    tpu.vector_store %arg16[%c0_17, %c5, %c0_18], %23 {strides = array<i32>} : memref<2x8x32xf32, #tpu.memory_space<vmem>>, vector<2x1x32xf32>,
    %c0_19 = arith.constant 0 : index
    %c192 = arith.constant 192 : index
    %24 = vector.load %arg1[%c0_19, %c192] : memref<2x256xf32, #tpu.memory_space<vmem>>, vector<2x32xf32>
    %c0_20 = arith.constant 0 : index
    %c6 = arith.constant 6 : index
    %c0_21 = arith.constant 0 : index
    %25 = vector.load %arg16[%c0_20, %c6, %c0_21] : memref<2x8x32xf32, #tpu.memory_space<vmem>>, vector<2x1x32xf32>
    %26 = vector.shape_cast %25 : vector<2x1x32xf32> to vector<2x32xf32>
    %27 = vector.shape_cast %24 : vector<2x32xf32> to vector<2x1x32xf32>
    tpu.vector_store %arg16[%c0_20, %c6, %c0_21], %27 {strides = array<i32>} : memref<2x8x32xf32, #tpu.memory_space<vmem>>, vector<2x1x32xf32>,
    %c0_22 = arith.constant 0 : index
    %c224 = arith.constant 224 : index
    %28 = vector.load %arg1[%c0_22, %c224] : memref<2x256xf32, #tpu.memory_space<vmem>>, vector<2x32xf32>
    %c0_23 = arith.constant 0 : index
    %c7 = arith.constant 7 : index
    %c0_24 = arith.constant 0 : index
    %29 = vector.load %arg16[%c0_23, %c7, %c0_24] : memref<2x8x32xf32, #tpu.memory_space<vmem>>, vector<2x1x32xf32>
    %30 = vector.shape_cast %29 : vector<2x1x32xf32> to vector<2x32xf32>
    %31 = vector.shape_cast %28 : vector<2x32xf32> to vector<2x1x32xf32>
    tpu.vector_store %arg16[%c0_23, %c7, %c0_24], %31 {strides = array<i32>} : memref<2x8x32xf32, #tpu.memory_space<vmem>>, vector<2x1x32xf32>,
    %c0_25 = arith.constant 0 : index
    %c0_26 = arith.constant 0 : index
    %c0_27 = arith.constant 0 : index
    %32 = vector.load %arg16[%c0_25, %c0_26, %c0_27] : memref<2x8x32xf32, #tpu.memory_space<vmem>>, vector<2x8x32xf32>
    %33 = vector.shape_cast %32 : vector<2x8x32xf32> to vector<16x32xf32>
    %c0_28 = arith.constant 0 : index
    %c0_29 = arith.constant 0 : index
    %34 = vector.load %arg3[%c0_28, %c0_29] : memref<1x32xf32, #tpu.memory_space<vmem>>, vector<1x32xf32>
    %c0_30 = arith.constant 0 : index
    %c0_31 = arith.constant 0 : index
    %35 = vector.load %arg4[%c0_30, %c0_31] : memref<1x32xf32, #tpu.memory_space<vmem>>, vector<1x32xf32>
    %cst = arith.constant dense<0.000000e+00> : vector<16xf32>
    %36 = vector.multi_reduction <add>, %33, %cst [1] : vector<16x32xf32> to vector<16xf32>
    %37 = vector.shape_cast %36 : vector<16xf32> to vector<16x1xf32>
    %cst_32 = arith.constant 3.200000e+01 : f32
    %38 = vector.broadcast %cst_32 : f32 to vector<16x1xf32>
    %39 = arith.divf %37, %38 : vector<16x1xf32>
    %40 = vector.broadcast %39 : vector<16x1xf32> to vector<16x32xf32>
    %41 = arith.subf %33, %40 : vector<16x32xf32>
    %42 = arith.mulf %41, %41 : vector<16x32xf32>
    %cst_33 = arith.constant dense<0.000000e+00> : vector<16xf32>
    %43 = vector.multi_reduction <add>, %42, %cst_33 [1] : vector<16x32xf32> to vector<16xf32>
    %44 = vector.shape_cast %43 : vector<16xf32> to vector<16x1xf32>
    %cst_34 = arith.constant 3.200000e+01 : f32
    %45 = vector.broadcast %cst_34 : f32 to vector<16x1xf32>
    %46 = arith.divf %44, %45 : vector<16x1xf32>
    %47 = vector.broadcast %39 : vector<16x1xf32> to vector<16x32xf32>
    %48 = arith.subf %33, %47 : vector<16x32xf32>
    %cst_35 = arith.constant 9.99999974E-6 : f32
    %49 = vector.broadcast %cst_35 : f32 to vector<16x1xf32>
    %50 = arith.addf %46, %49 : vector<16x1xf32>
    %51 = math.rsqrt %50 : vector<16x1xf32>
    %52 = vector.broadcast %51 : vector<16x1xf32> to vector<16x32xf32>
    %53 = arith.mulf %48, %52 : vector<16x32xf32>
    %54 = vector.broadcast %34 : vector<1x32xf32> to vector<16x32xf32>
    %55 = arith.mulf %53, %54 : vector<16x32xf32>
    %56 = vector.broadcast %35 : vector<1x32xf32> to vector<16x32xf32>
    %57 = arith.addf %55, %56 : vector<16x32xf32>
    %c0_36 = arith.constant 0 : index
    %c0_37 = arith.constant 0 : index
    %58 = vector.load %arg5[%c0_36, %c0_37] : memref<32x96xf32, #tpu.memory_space<vmem>>, vector<32x96xf32>
    %cst_38 = arith.constant dense<0.000000e+00> : vector<16x96xf32>
    %59 = tpu.matmul %57, %58, %cst_38 {dimension_numbers = #tpu.dot_dimension_numbers<[1], [0], [0], [1], [0, 0, 1, 1], [], []>} : vector<16x32xf32>, vector<32x96xf32>, vector<16x96xf32> -> vector<16x96xf32>
    %c0_39 = arith.constant 0 : index
    %c0_40 = arith.constant 0 : index
    %60 = vector.load %arg6[%c0_39, %c0_40] : memref<1x96xf32, #tpu.memory_space<vmem>>, vector<1x96xf32>
    %61 = vector.broadcast %60 : vector<1x96xf32> to vector<16x96xf32>
    %62 = arith.addf %59, %61 : vector<16x96xf32>
    %63 = vector.extract_strided_slice %62 {offsets = [0, 0], sizes = [16, 32], strides = [1, 1]} : vector<16x96xf32> to vector<16x32xf32>
    %64 = vector.shape_cast %63 : vector<16x32xf32> to vector<2x8x32xf32>
    %65 = vector.extract_strided_slice %62 {offsets = [0, 32], sizes = [16, 32], strides = [1, 1]} : vector<16x96xf32> to vector<16x32xf32>
    %66 = vector.shape_cast %65 : vector<16x32xf32> to vector<2x8x32xf32>
    %67 = vector.extract_strided_slice %62 {offsets = [0, 64], sizes = [16, 32], strides = [1, 1]} : vector<16x96xf32> to vector<16x32xf32>
    %68 = vector.shape_cast %67 : vector<16x32xf32> to vector<2x8x32xf32>
    %69 = vector.extract_strided_slice %64 {offsets = [0, 0, 0], sizes = [2, 8, 8], strides = [1, 1, 1]} : vector<2x8x32xf32> to vector<2x8x8xf32>
    %70 = vector.extract_strided_slice %64 {offsets = [0, 0, 8], sizes = [2, 8, 8], strides = [1, 1, 1]} : vector<2x8x32xf32> to vector<2x8x8xf32>
    %71 = vector.extract_strided_slice %64 {offsets = [0, 0, 16], sizes = [2, 8, 8], strides = [1, 1, 1]} : vector<2x8x32xf32> to vector<2x8x8xf32>
    %72 = vector.extract_strided_slice %64 {offsets = [0, 0, 24], sizes = [2, 8, 8], strides = [1, 1, 1]} : vector<2x8x32xf32> to vector<2x8x8xf32>
    %73 = tpu.concatenate %69, %70, %71, %72 in 0 : vector<2x8x8xf32>, vector<2x8x8xf32>, vector<2x8x8xf32>, vector<2x8x8xf32> -> vector<8x8x8xf32>
    %74 = vector.extract_strided_slice %66 {offsets = [0, 0, 0], sizes = [2, 8, 8], strides = [1, 1, 1]} : vector<2x8x32xf32> to vector<2x8x8xf32>
    %75 = vector.extract_strided_slice %66 {offsets = [0, 0, 8], sizes = [2, 8, 8], strides = [1, 1, 1]} : vector<2x8x32xf32> to vector<2x8x8xf32>
    %76 = vector.extract_strided_slice %66 {offsets = [0, 0, 16], sizes = [2, 8, 8], strides = [1, 1, 1]} : vector<2x8x32xf32> to vector<2x8x8xf32>
    %77 = vector.extract_strided_slice %66 {offsets = [0, 0, 24], sizes = [2, 8, 8], strides = [1, 1, 1]} : vector<2x8x32xf32> to vector<2x8x8xf32>
    %78 = tpu.concatenate %74, %75, %76, %77 in 0 : vector<2x8x8xf32>, vector<2x8x8xf32>, vector<2x8x8xf32>, vector<2x8x8xf32> -> vector<8x8x8xf32>
    %79 = vector.extract_strided_slice %68 {offsets = [0, 0, 0], sizes = [2, 8, 8], strides = [1, 1, 1]} : vector<2x8x32xf32> to vector<2x8x8xf32>
    %80 = vector.extract_strided_slice %68 {offsets = [0, 0, 8], sizes = [2, 8, 8], strides = [1, 1, 1]} : vector<2x8x32xf32> to vector<2x8x8xf32>
    %81 = vector.extract_strided_slice %68 {offsets = [0, 0, 16], sizes = [2, 8, 8], strides = [1, 1, 1]} : vector<2x8x32xf32> to vector<2x8x8xf32>
    %82 = vector.extract_strided_slice %68 {offsets = [0, 0, 24], sizes = [2, 8, 8], strides = [1, 1, 1]} : vector<2x8x32xf32> to vector<2x8x8xf32>
    %83 = tpu.concatenate %79, %80, %81, %82 in 0 : vector<2x8x8xf32>, vector<2x8x8xf32>, vector<2x8x8xf32>, vector<2x8x8xf32> -> vector<8x8x8xf32>
    "tpu.trace_start"() <{level = 10 : i32, message = "btd,bsd->bts"}> : () -> ()
    %cst_41 = arith.constant dense<0.000000e+00> : vector<8x8x8xf32>
    %84 = tpu.matmul %73, %78, %cst_41 {dimension_numbers = #tpu.dot_dimension_numbers<[2], [2], [1], [1], [0, 0, 0, 1, 1, 1], [0], [0]>} : vector<8x8x8xf32>, vector<8x8x8xf32>, vector<8x8x8xf32> -> vector<8x8x8xf32>
    "tpu.trace_stop"() : () -> ()
    %c0_42 = arith.constant 0 : index
    %c0_43 = arith.constant 0 : index
    %85 = vector.load %arg2[%c0_42, %c0_43] : memref<8x8xf32, #tpu.memory_space<vmem>>, vector<8x8xf32>
    %86 = vector.shape_cast %85 : vector<8x8xf32> to vector<1x8x8xf32>
    %87 = vector.broadcast %86 : vector<1x8x8xf32> to vector<8x8x8xf32>
    %88 = arith.addf %84, %87 : vector<8x8x8xf32>
    %cst_44 = arith.constant dense<0xFF800000> : vector<8x8xf32>
    %89 = vector.multi_reduction <maximumf>, %88, %cst_44 [2] : vector<8x8x8xf32> to vector<8x8xf32>
    %90 = vector.shape_cast %89 : vector<8x8xf32> to vector<8x8x1xf32>
    %91 = vector.broadcast %90 : vector<8x8x1xf32> to vector<8x8x8xf32>
    %92 = arith.subf %88, %91 : vector<8x8x8xf32>
    %93 = math.exp %92 : vector<8x8x8xf32>
    %cst_45 = arith.constant dense<0.000000e+00> : vector<8x8xf32>
    %94 = vector.multi_reduction <add>, %93, %cst_45 [2] : vector<8x8x8xf32> to vector<8x8xf32>
    %95 = vector.shape_cast %94 : vector<8x8xf32> to vector<8x8x1xf32>
    %96 = tpu.reciprocal %95 {approx = true} : vector<8x8x1xf32> -> vector<8x8x1xf32>
    %97 = vector.broadcast %96 : vector<8x8x1xf32> to vector<8x8x8xf32>
    %98 = arith.mulf %93, %97 : vector<8x8x8xf32>
    "tpu.trace_start"() <{level = 10 : i32, message = "bts,bsd->btd"}> : () -> ()
    %cst_46 = arith.constant dense<0.000000e+00> : vector<8x8x8xf32>
    %99 = tpu.matmul %98, %83, %cst_46 {dimension_numbers = #tpu.dot_dimension_numbers<[2], [1], [1], [2], [0, 0, 0, 1, 1, 2], [0], [0]>} : vector<8x8x8xf32>, vector<8x8x8xf32>, vector<8x8x8xf32> -> vector<8x8x8xf32>
    "tpu.trace_stop"() : () -> ()
    %100 = vector.extract_strided_slice %99 {offsets = [0, 0, 0], sizes = [2, 8, 8], strides = [1, 1, 1]} : vector<8x8x8xf32> to vector<2x8x8xf32>
    %101 = vector.shape_cast %100 : vector<2x8x8xf32> to vector<16x8xf32>
    %102 = vector.extract_strided_slice %99 {offsets = [2, 0, 0], sizes = [2, 8, 8], strides = [1, 1, 1]} : vector<8x8x8xf32> to vector<2x8x8xf32>
    %103 = vector.shape_cast %102 : vector<2x8x8xf32> to vector<16x8xf32>
    %104 = vector.extract_strided_slice %99 {offsets = [4, 0, 0], sizes = [2, 8, 8], strides = [1, 1, 1]} : vector<8x8x8xf32> to vector<2x8x8xf32>
    %105 = vector.shape_cast %104 : vector<2x8x8xf32> to vector<16x8xf32>
    %106 = vector.extract_strided_slice %99 {offsets = [6, 0, 0], sizes = [2, 8, 8], strides = [1, 1, 1]} : vector<8x8x8xf32> to vector<2x8x8xf32>
    %107 = vector.shape_cast %106 : vector<2x8x8xf32> to vector<16x8xf32>
    %108 = tpu.concatenate %101, %103, %105, %107 in 1 : vector<16x8xf32>, vector<16x8xf32>, vector<16x8xf32>, vector<16x8xf32> -> vector<16x32xf32>
    %c0_47 = arith.constant 0 : index
    %c0_48 = arith.constant 0 : index
    %109 = vector.load %arg7[%c0_47, %c0_48] : memref<32x32xf32, #tpu.memory_space<vmem>>, vector<32x32xf32>
    %cst_49 = arith.constant dense<0.000000e+00> : vector<16x32xf32>
    %110 = tpu.matmul %108, %109, %cst_49 {dimension_numbers = #tpu.dot_dimension_numbers<[1], [0], [0], [1], [0, 0, 1, 1], [], []>} : vector<16x32xf32>, vector<32x32xf32>, vector<16x32xf32> -> vector<16x32xf32>
    %c0_50 = arith.constant 0 : index
    %c0_51 = arith.constant 0 : index
    %111 = vector.load %arg8[%c0_50, %c0_51] : memref<1x32xf32, #tpu.memory_space<vmem>>, vector<1x32xf32>
    %112 = vector.broadcast %111 : vector<1x32xf32> to vector<16x32xf32>
    %113 = arith.addf %110, %112 : vector<16x32xf32>
    %114 = arith.addf %33, %113 : vector<16x32xf32>
    %c0_52 = arith.constant 0 : index
    %c0_53 = arith.constant 0 : index
    %115 = vector.load %arg9[%c0_52, %c0_53] : memref<1x32xf32, #tpu.memory_space<vmem>>, vector<1x32xf32>
    %c0_54 = arith.constant 0 : index
    %c0_55 = arith.constant 0 : index
    %116 = vector.load %arg10[%c0_54, %c0_55] : memref<1x32xf32, #tpu.memory_space<vmem>>, vector<1x32xf32>
    %cst_56 = arith.constant dense<0.000000e+00> : vector<16xf32>
    %117 = vector.multi_reduction <add>, %114, %cst_56 [1] : vector<16x32xf32> to vector<16xf32>
    %118 = vector.shape_cast %117 : vector<16xf32> to vector<16x1xf32>
    %cst_57 = arith.constant 3.200000e+01 : f32
    %119 = vector.broadcast %cst_57 : f32 to vector<16x1xf32>
    %120 = arith.divf %118, %119 : vector<16x1xf32>
    %121 = vector.broadcast %120 : vector<16x1xf32> to vector<16x32xf32>
    %122 = arith.subf %114, %121 : vector<16x32xf32>
    %123 = arith.mulf %122, %122 : vector<16x32xf32>
    %cst_58 = arith.constant dense<0.000000e+00> : vector<16xf32>
    %124 = vector.multi_reduction <add>, %123, %cst_58 [1] : vector<16x32xf32> to vector<16xf32>
    %125 = vector.shape_cast %124 : vector<16xf32> to vector<16x1xf32>
    %cst_59 = arith.constant 3.200000e+01 : f32
    %126 = vector.broadcast %cst_59 : f32 to vector<16x1xf32>
    %127 = arith.divf %125, %126 : vector<16x1xf32>
    %128 = vector.broadcast %120 : vector<16x1xf32> to vector<16x32xf32>
    %129 = arith.subf %114, %128 : vector<16x32xf32>
    %cst_60 = arith.constant 9.99999974E-6 : f32
    %130 = vector.broadcast %cst_60 : f32 to vector<16x1xf32>
    %131 = arith.addf %127, %130 : vector<16x1xf32>
    %132 = math.rsqrt %131 : vector<16x1xf32>
    %133 = vector.broadcast %132 : vector<16x1xf32> to vector<16x32xf32>
    %134 = arith.mulf %129, %133 : vector<16x32xf32>
    %135 = vector.broadcast %115 : vector<1x32xf32> to vector<16x32xf32>
    %136 = arith.mulf %134, %135 : vector<16x32xf32>
    %137 = vector.broadcast %116 : vector<1x32xf32> to vector<16x32xf32>
    %138 = arith.addf %136, %137 : vector<16x32xf32>
    %c0_61 = arith.constant 0 : index
    %c0_62 = arith.constant 0 : index
    %139 = vector.load %arg11[%c0_61, %c0_62] : memref<32x128xf32, #tpu.memory_space<vmem>>, vector<32x128xf32>
    %cst_63 = arith.constant dense<0.000000e+00> : vector<16x128xf32>
    %140 = tpu.matmul %138, %139, %cst_63 {dimension_numbers = #tpu.dot_dimension_numbers<[1], [0], [0], [1], [0, 0, 1, 1], [], []>} : vector<16x32xf32>, vector<32x128xf32>, vector<16x128xf32> -> vector<16x128xf32>
    %c0_64 = arith.constant 0 : index
    %c0_65 = arith.constant 0 : index
    %141 = vector.load %arg12[%c0_64, %c0_65] : memref<1x128xf32, #tpu.memory_space<vmem>>, vector<1x128xf32>
    %142 = vector.broadcast %141 : vector<1x128xf32> to vector<16x128xf32>
    %143 = arith.addf %140, %142 : vector<16x128xf32>
    %cst_66 = arith.constant 5.000000e-01 : f32
    %144 = vector.broadcast %cst_66 : f32 to vector<16x128xf32>
    %145 = arith.mulf %144, %143 : vector<16x128xf32>
    %cst_67 = arith.constant 4.471500e-02 : f32
    %146 = vector.broadcast %cst_67 : f32 to vector<16x128xf32>
    %147 = arith.mulf %146, %143 : vector<16x128xf32>
    %148 = arith.mulf %147, %143 : vector<16x128xf32>
    %149 = arith.mulf %148, %143 : vector<16x128xf32>
    %150 = arith.addf %143, %149 : vector<16x128xf32>
    %cst_68 = arith.constant 0.797884583 : f32
    %151 = vector.broadcast %cst_68 : f32 to vector<16x128xf32>
    %152 = arith.mulf %151, %150 : vector<16x128xf32>
    %153 = math.tanh %152 : vector<16x128xf32>
    %cst_69 = arith.constant 1.000000e+00 : f32
    %154 = vector.broadcast %cst_69 : f32 to vector<16x128xf32>
    %155 = arith.addf %154, %153 : vector<16x128xf32>
    %156 = arith.mulf %145, %155 : vector<16x128xf32>
    %c0_70 = arith.constant 0 : index
    %c0_71 = arith.constant 0 : index
    %157 = vector.load %arg13[%c0_70, %c0_71] : memref<128x32xf32, #tpu.memory_space<vmem>>, vector<128x32xf32>
    %cst_72 = arith.constant dense<0.000000e+00> : vector<16x32xf32>
    %158 = tpu.matmul %156, %157, %cst_72 {dimension_numbers = #tpu.dot_dimension_numbers<[1], [0], [0], [1], [0, 0, 1, 1], [], []>} : vector<16x128xf32>, vector<128x32xf32>, vector<16x32xf32> -> vector<16x32xf32>
    %c0_73 = arith.constant 0 : index
    %c0_74 = arith.constant 0 : index
    %159 = vector.load %arg14[%c0_73, %c0_74] : memref<1x32xf32, #tpu.memory_space<vmem>>, vector<1x32xf32>
    %160 = vector.broadcast %159 : vector<1x32xf32> to vector<16x32xf32>
    %161 = arith.addf %158, %160 : vector<16x32xf32>
    %162 = arith.addf %114, %161 : vector<16x32xf32>
    %163 = vector.shape_cast %162 : vector<16x32xf32> to vector<2x8x32xf32>
    %c0_75 = arith.constant 0 : index
    %c0_76 = arith.constant 0 : index
    %c0_77 = arith.constant 0 : index
    %164 = vector.load %arg16[%c0_75, %c0_76, %c0_77] : memref<2x8x32xf32, #tpu.memory_space<vmem>>, vector<2x8x32xf32>
    tpu.vector_store %arg16[%c0_75, %c0_76, %c0_77], %163 {strides = array<i32>} : memref<2x8x32xf32, #tpu.memory_space<vmem>>, vector<2x8x32xf32>,
    %c0_78 = arith.constant 0 : index
    %c0_79 = arith.constant 0 : index
    %c0_80 = arith.constant 0 : index
    %165 = vector.load %arg16[%c0_78, %c0_79, %c0_80] : memref<2x8x32xf32, #tpu.memory_space<vmem>>, vector<2x1x32xf32>
    %166 = vector.shape_cast %165 : vector<2x1x32xf32> to vector<2x32xf32>
    %c0_81 = arith.constant 0 : index
    %c1_82 = arith.constant 1 : index
    %c0_83 = arith.constant 0 : index
    %167 = vector.load %arg16[%c0_81, %c1_82, %c0_83] : memref<2x8x32xf32, #tpu.memory_space<vmem>>, vector<2x1x32xf32>
    %168 = vector.shape_cast %167 : vector<2x1x32xf32> to vector<2x32xf32>
    %c0_84 = arith.constant 0 : index
    %c2_85 = arith.constant 2 : index
    %c0_86 = arith.constant 0 : index
    %169 = vector.load %arg16[%c0_84, %c2_85, %c0_86] : memref<2x8x32xf32, #tpu.memory_space<vmem>>, vector<2x1x32xf32>
    %170 = vector.shape_cast %169 : vector<2x1x32xf32> to vector<2x32xf32>
    %c0_87 = arith.constant 0 : index
    %c3_88 = arith.constant 3 : index
    %c0_89 = arith.constant 0 : index
    %171 = vector.load %arg16[%c0_87, %c3_88, %c0_89] : memref<2x8x32xf32, #tpu.memory_space<vmem>>, vector<2x1x32xf32>
    %172 = vector.shape_cast %171 : vector<2x1x32xf32> to vector<2x32xf32>
    %c0_90 = arith.constant 0 : index
    %c4_91 = arith.constant 4 : index
    %c0_92 = arith.constant 0 : index
    %173 = vector.load %arg16[%c0_90, %c4_91, %c0_92] : memref<2x8x32xf32, #tpu.memory_space<vmem>>, vector<2x1x32xf32>
    %174 = vector.shape_cast %173 : vector<2x1x32xf32> to vector<2x32xf32>
    %c0_93 = arith.constant 0 : index
    %c5_94 = arith.constant 5 : index
    %c0_95 = arith.constant 0 : index
    %175 = vector.load %arg16[%c0_93, %c5_94, %c0_95] : memref<2x8x32xf32, #tpu.memory_space<vmem>>, vector<2x1x32xf32>
    %176 = vector.shape_cast %175 : vector<2x1x32xf32> to vector<2x32xf32>
    %c0_96 = arith.constant 0 : index
    %c6_97 = arith.constant 6 : index
    %c0_98 = arith.constant 0 : index
    %177 = vector.load %arg16[%c0_96, %c6_97, %c0_98] : memref<2x8x32xf32, #tpu.memory_space<vmem>>, vector<2x1x32xf32>
    %178 = vector.shape_cast %177 : vector<2x1x32xf32> to vector<2x32xf32>
    %c0_99 = arith.constant 0 : index
    %c7_100 = arith.constant 7 : index
    %c0_101 = arith.constant 0 : index
    %179 = vector.load %arg16[%c0_99, %c7_100, %c0_101] : memref<2x8x32xf32, #tpu.memory_space<vmem>>, vector<2x1x32xf32>
    %180 = vector.shape_cast %179 : vector<2x1x32xf32> to vector<2x32xf32>
    %181 = tpu.concatenate %166, %168, %170, %172, %174, %176, %178, %180 in 1 : vector<2x32xf32>, vector<2x32xf32>, vector<2x32xf32>, vector<2x32xf32>, vector<2x32xf32>, vector<2x32xf32>, vector<2x32xf32>, vector<2x32xf32> -> vector<2x256xf32>
    %c0_102 = arith.constant 0 : index
    %c0_103 = arith.constant 0 : index
    %182 = vector.load %arg15[%c0_102, %c0_103] : memref<2x256xf32, #tpu.memory_space<vmem>>, vector<2x256xf32>
    tpu.vector_store %arg15[%c0_102, %c0_103], %181 {strides = array<i32>} : memref<2x256xf32, #tpu.memory_space<vmem>>, vector<2x256xf32>,
    return
  }
  func.func @transform_0(%arg0: i32) -> (i32, i32) {
    %c0_i32 = arith.constant 0 : i32
    %c0_i32_0 = arith.constant 0 : i32
    return %arg0, %c0_i32 : i32, i32
  }
  func.func @transform_1(%arg0: i32) -> (i32, i32) {
    %c0_i32 = arith.constant 0 : i32
    %c0_i32_0 = arith.constant 0 : i32
    %c0_i32_1 = arith.constant 0 : i32
    return %c0_i32, %c0_i32_0 : i32, i32
  }
  func.func @transform_2(%arg0: i32) -> (i32, i32) {
    %c0_i32 = arith.constant 0 : i32
    %c0_i32_0 = arith.constant 0 : i32
    %c0_i32_1 = arith.constant 0 : i32
    return %c0_i32, %c0_i32_0 : i32, i32
  }
  func.func @transform_3(%arg0: i32) -> (i32, i32) {
    %c0_i32 = arith.constant 0 : i32
    %c0_i32_0 = arith.constant 0 : i32
    %c0_i32_1 = arith.constant 0 : i32
    return %c0_i32, %c0_i32_0 : i32, i32
  }
  func.func @transform_4(%arg0: i32) -> (i32, i32) {
    %c0_i32 = arith.constant 0 : i32
    %c0_i32_0 = arith.constant 0 : i32
    %c0_i32_1 = arith.constant 0 : i32
    return %c0_i32, %c0_i32_0 : i32, i32
  }
  func.func @transform_5(%arg0: i32) -> (i32, i32) {
    %c0_i32 = arith.constant 0 : i32
    %c0_i32_0 = arith.constant 0 : i32
    %c0_i32_1 = arith.constant 0 : i32
    return %c0_i32, %c0_i32_0 : i32, i32
  }
  func.func @transform_6(%arg0: i32) -> (i32, i32) {
    %c0_i32 = arith.constant 0 : i32
    %c0_i32_0 = arith.constant 0 : i32
    %c0_i32_1 = arith.constant 0 : i32
    return %c0_i32, %c0_i32_0 : i32, i32
  }
  func.func @transform_7(%arg0: i32) -> (i32, i32) {
    %c0_i32 = arith.constant 0 : i32
    %c0_i32_0 = arith.constant 0 : i32
    %c0_i32_1 = arith.constant 0 : i32
    return %c0_i32, %c0_i32_0 : i32, i32
  }
  func.func @transform_8(%arg0: i32) -> (i32, i32) {
    %c0_i32 = arith.constant 0 : i32
    %c0_i32_0 = arith.constant 0 : i32
    %c0_i32_1 = arith.constant 0 : i32
    return %c0_i32, %c0_i32_0 : i32, i32
  }
  func.func @transform_9(%arg0: i32) -> (i32, i32) {
    %c0_i32 = arith.constant 0 : i32
    %c0_i32_0 = arith.constant 0 : i32
    %c0_i32_1 = arith.constant 0 : i32
    return %c0_i32, %c0_i32_0 : i32, i32
  }
  func.func @transform_10(%arg0: i32) -> (i32, i32) {
    %c0_i32 = arith.constant 0 : i32
    %c0_i32_0 = arith.constant 0 : i32
    %c0_i32_1 = arith.constant 0 : i32
    return %c0_i32, %c0_i32_0 : i32, i32
  }
  func.func @transform_11(%arg0: i32) -> (i32, i32) {
    %c0_i32 = arith.constant 0 : i32
    %c0_i32_0 = arith.constant 0 : i32
    %c0_i32_1 = arith.constant 0 : i32
    return %c0_i32, %c0_i32_0 : i32, i32
  }
  func.func @transform_12(%arg0: i32) -> (i32, i32) {
    %c0_i32 = arith.constant 0 : i32
    %c0_i32_0 = arith.constant 0 : i32
    %c0_i32_1 = arith.constant 0 : i32
    return %c0_i32, %c0_i32_0 : i32, i32
  }
  func.func @transform_13(%arg0: i32) -> (i32, i32) {
    %c0_i32 = arith.constant 0 : i32
    %c0_i32_0 = arith.constant 0 : i32
    %c0_i32_1 = arith.constant 0 : i32
    return %c0_i32, %c0_i32_0 : i32, i32
  }
  func.func @transform_14(%arg0: i32) -> (i32, i32) {
    %c0_i32 = arith.constant 0 : i32
    %c0_i32_0 = arith.constant 0 : i32
    return %arg0, %c0_i32 : i32, i32
  }
}

</mosaic_0001>

<bundles_post_ra>
// kernel: tpu_custom_call.1
= control target key start
LH: loop header
LB: loop body
LE: loop exit
PB: predicated region body
PF: predicated region fallthrough
CT: control target
= control target key end

     0   :  { %v73_v0 = vlaneseq  ;;  %vm60_vm0 = vcmask 253952   ;;  %s3037_s0 = inlined_call_operand.vmem [shape: f32[2,256], index: 0, kind: input, shape index: {}]   ;;  %s3038_s1 = inlined_call_operand.vmem [shape: f32[8,8], index: 1, kind: input, shape index: {}]   ;;  %s3039_s2 = inlined_call_operand.vmem [shape: f32[1,32], index: 2, kind: input, shape index: {}]   ;;  %s3040_s3 = inlined_call_operand.vmem [shape: f32[1,32], index: 3, kind: input, shape index: {}]   ;;  %s3041_s4 = inlined_call_operand.vmem [shape: f32[32,96], index: 4, kind: input, shape index: {}]   ;;  %s3042_s5 = inlined_call_operand.vmem [shape: f32[1,96], index: 5, kind: input, shape index: {}]   ;;  %s3043_s6 = inlined_call_operand.vmem [shape: f32[32,32], index: 6, kind: input, shape index: {}]   ;;  %s3044_s7 = inlined_call_operand.vmem [shape: f32[1,32], index: 7, kind: input, shape index: {}]   ;;  %s3045_s8 = inlined_call_operand.vmem [shape: f32[1,32], index: 8, kind: input, shape index: {}]   ;;  %s3046_s9 = inlined_call_operand.vmem [shape: f32[1,32], index: 9, kind: input, shape index: {}]   ;;  %s3047_s10 = inlined_call_operand.vmem [shape: f32[32,128], index: 10, kind: input, shape index: {}]   ;;  %s3048_s11 = inlined_call_operand.vmem [shape: f32[1,128], index: 11, kind: input, shape index: {}]   ;;  %s3049_s12 = inlined_call_operand.vmem [shape: f32[128,32], index: 12, kind: input, shape index: {}]   ;;  %s3050_s13 = inlined_call_operand.vmem [shape: f32[1,32], index: 13, kind: input, shape index: {}]   ;;  %s3051_s14 = inlined_call_operand.hbm [shape: f32[2,256], index: 14, kind: output, shape index: {}]  }
   0x1   :  { %v2181_v1 = vld.sshfl [vmem:[%s3037_s0] sm:$0x11 pattern:$0x75316420] }
   0x2   :  { %v124_v2 = vcombine.high %v2181_v1, %v2181_v1  ;;  %v2183_v3 = vld.sshfl [vmem:[%s3037_s0 + $0x2] sm:$0x11 pattern:$0x75316420]  ;;  %v74_v4 = vshrl.u32 %v73_v0, 7 }
   0x3   :  { %v164_v5 = vcombine.high %v2183_v3, %v2183_v3  ;;  %61 = vst.msk [vmem:[#allocation2] sm:$0x1] %vm60_vm0, %v2181_v1  ;;  %153 = vst.msk [vmem:[#allocation2 + $0x4] sm:$0x1] %vm60_vm0, %v2183_v3 }
   0x4   :  { %19 = vsyncpa [#allocation4], 0  ;;  %62 = vst.msk [vmem:[#allocation2 + $0x8] sm:$0x1] %vm60_vm0, %v124_v2  ;;  %v75_v6 = vsub.s32 0, %v74_v4  ;;  %s2577_s17 = smov 32  }
   0x5   :  { %154 = vst.msk [vmem:[#allocation2 + $0xc] sm:$0x1] %vm60_vm0, %v164_v5  ;;  %s2578_s18 = smov 96   ;;  %s2579_s0 = smov 64   ;;  %vm237_vm1 = vcmask 261120   ;;  %v281_v37 = vld [vmem:[%s3041_s4] sm:$0xff] }
   0x6   :  { %v128_v7 = vrot.slane %v2181_v1, %v75_v6  ;;  %v168_v8 = vrot.slane %v2183_v3, %v75_v6  ;;  %v106_v9 = vrot.slane %v124_v2, %v75_v6  ;;  %v172_v10 = vrot.slane %v164_v5, %v75_v6  ;;  %v282_v38 = vld [vmem:[%s3041_s4 + $0x8] sm:$0xff]  ;;  %v283_v40 = vld [vmem:[%s3041_s4 + $0x10] sm:$0xff]  ;;  %v284_v41 = vld [vmem:[%s3041_s4 + $0x18] sm:$0xff]  ;;  %s2583_s15 = smov 104   ;;  %s2585_s27 = smov 8  }
   0x7   :  { %v2441_v39 = vpack.c.bf16 %v282_v38, %v281_v37  ;;  %v2445_v42 = vpack.c.bf16 %v284_v41, %v283_v40  ;;  %v2186_v50 = vld [vmem:[%s3039_s2] ss:$0 sm:$0xff]  ;;  %v2580_v59 = vmov 0.0   ;;  %vm2581_vm2 = vmmov 0   ;;  %s2586_s28 = smov 16   ;;  %s2587_s29 = smov 24  }
   0x8   :  { %133 = vrot.lane.b32.xlu1 %v128_v7, %s2577_s17  ;;  %81 = vrot.lane.b32.xlu0 %v128_v7, %s2578_s18  ;;  %v2187_v52 = vld [vmem:[%s3040_s3] ss:$0 sm:$0xff]  ;;  %s2582_s3 = smov 120   ;;  %vm390_vm3 = vcmask 64512   ;;  %vm1719_vm4 = vcmask 130048   ;;  %vm1722_vm5 = vcmask 195584  }
   0x9   :  { %2442 = vmatprep.subr.bf16.mxu1 %v2441_v39  ;;  %2314 = vmatprep.subr.mxu0 %v2580_v59  ;;  %v2188_v60 = vld [vmem:[%s3042_s5] ss:$0 sm:$0xff]  ;;  %s2584_s5 = smov 112   ;;  %vm2094_vm6 = vcmask 1041409   ;;  %vm2145_vm7 = vcmask 523264   ;;  %vm2147_vm8 = vcmask 785408  }
   0xa   :  { %2444 = vmatpush3.bf16.msra.mxu1 %v2441_v39  ;;  %2316 = vmatprep.mubr.msk.f32.mxu0 %vm2581_vm2, %v2580_v59 }
   0xb   :  { %2446 = vmatprep.subr.bf16.mxu1 %v2445_v42 }
   0xc   :  { %173 = vrot.lane.b32.xlu1 %v168_v8, %s2578_s18  ;;  %107 = vrot.lane.b32.xlu0 %v128_v7, %s2579_s0 }
   0xe   :  { %2448 = vmatpush3.bf16.msra.mxu1 %v2445_v42 }
   0xf   :  { %2304 = vmatprep.subr.mxu1 %v2580_v59 }
  0x10   :  { %225 = vrot.lane.b32.xlu1 %v168_v8, %s2577_s17  ;;  %199 = vrot.lane.b32.xlu0 %v168_v8, %s2579_s0 }
  0x14   :  { %109 = vrot.lane.b32.xlu1 %v106_v9, %s2579_s0  ;;  %83 = vrot.lane.b32.xlu0 %v106_v9, %s2578_s18 }
  0x18   :  { %175 = vrot.lane.b32.xlu1 %v172_v10, %s2578_s18  ;;  %135 = vrot.lane.b32.xlu0 %v106_v9, %s2577_s17 }
  0x1c   :  { %227 = vrot.lane.b32.xlu1 %v172_v10, %s2577_s17  ;;  %201 = vrot.lane.b32.xlu0 %v172_v10, %s2579_s0 }
  0x7a   :  { %v134_v11 = vpop.permute.xlu1 %133  ;;  %v82_v12 = vpop.permute.xlu0 %81 }
  0x7b   :  { %139 = vst.msk [vmem:[#allocation2 + $0x3] sm:$0x1] %vm60_vm0, %v134_v11  ;;  %87 = vst.msk [vmem:[#allocation2 + $0x1] sm:$0x1] %vm60_vm0, %v82_v12 }
  0x7e   :  { %v174_v13 = vpop.permute.xlu1 %173  ;;  %v108_v14 = vpop.permute.xlu0 %107 }
  0x7f   :  { %179 = vst.msk [vmem:[#allocation2 + $0x5] sm:$0x1] %vm60_vm0, %v174_v13  ;;  %113 = vst.msk [vmem:[#allocation2 + $0x2] sm:$0x1] %vm60_vm0, %v108_v14 }
  0x82   :  { %v226_v15 = vpop.permute.xlu1 %225  ;;  %v200_v16 = vpop.permute.xlu0 %199 }
  0x83   :  { %231 = vst.msk [vmem:[#allocation2 + $0x7] sm:$0x1] %vm60_vm0, %v226_v15  ;;  %205 = vst.msk [vmem:[#allocation2 + $0x6] sm:$0x1] %vm60_vm0, %v200_v16  ;;  %v387_v15 = vld [vmem:[%s3038_s1] sm:$0xff] }
  0x86   :  { %v110_v17 = vpop.permute.xlu1 %109  ;;  %v84_v18 = vpop.permute.xlu0 %83 }
  0x87   :  { %114 = vst.msk [vmem:[#allocation2 + $0xa] sm:$0x1] %vm60_vm0, %v110_v17  ;;  %88 = vst.msk [vmem:[#allocation2 + $0x9] sm:$0x1] %vm60_vm0, %v84_v18 }
  0x8a   :  { %v176_v19 = vpop.permute.xlu1 %175  ;;  %v136_v20 = vpop.permute.xlu0 %135  ;;  %v2694_v21 = vld [vmem:[#allocation2] sm:$0xff] }
  0x8b   :  { %180 = vst.msk [vmem:[#allocation2 + $0xd] sm:$0x1] %vm60_vm0, %v176_v19  ;;  %140 = vst.msk [vmem:[#allocation2 + $0xb] sm:$0x1] %vm60_vm0, %v136_v20  ;;  %v238_v22 = vsel %vm237_vm1, %v2694_v21, 0.0 }
  0x8c   :  { %239 = vadd.xlane.f32.xlu0 %v238_v22 }
  0x8e   :  { %v228_v23 = vpop.permute.xlu1 %227  ;;  %v202_v24 = vpop.permute.xlu0 %201 }
  0x8f   :  { %232 = vst.msk [vmem:[#allocation2 + $0xf] sm:$0x1] %vm60_vm0, %v228_v23  ;;  %206 = vst.msk [vmem:[#allocation2 + $0xe] sm:$0x1] %vm60_vm0, %v202_v24 }
  0x96   :  { %v2702_v25 = vld [vmem:[#allocation2 + $0x8] sm:$0xff] }
  0x97   :  { %v241_v26 = vsel %vm237_vm1, %v2702_v25, 0.0 }
  0x98   :  { %242 = vadd.xlane.f32.xlu1 %v241_v26 }
 0x119   :  { %v240_v27 = vpop.xlane.xlu0 %239 }
 0x11a   :  { %v245_v28 = vmul.f32 0.03125, %v240_v27 }
 0x11c   :  { %v247_v29 = vsub.f32 %v2694_v21, %v245_v28 }
 0x11e   :  { %v249_v30 = vmul.f32 %v247_v29, %v247_v29 }
 0x120   :  { %v251_v31 = vsel %vm237_vm1, %v249_v30, 0.0 }
 0x121   :  { %252 = vadd.xlane.f32.xlu0 %v251_v31 }
 0x125   :  { %v243_v32 = vpop.xlane.xlu1 %242 }
 0x126   :  { %v246_v33 = vmul.f32 0.03125, %v243_v32 }
 0x128   :  { %v248_v34 = vsub.f32 %v2702_v25, %v246_v33 }
 0x12a   :  { %v250_v35 = vmul.f32 %v248_v34, %v248_v34 }
 0x12c   :  { %v254_v36 = vsel %vm237_vm1, %v250_v35, 0.0 }
 0x12d   :  { %255 = vadd.xlane.f32.xlu0 %v254_v36 }
 0x1ae   :  { %v253_v43 = vpop.xlane.xlu0 %252 }
 0x1af   :  { %v257_v44 = vmul.f32 0.03125, %v253_v43 }
 0x1b1   :  { %v259_v45 = vadd.f32 1e-05, %v257_v44 }
 0x1b3   :  { %2509 = vrsqrt.f32 %v259_v45 }
 0x1ba   :  { %v256_v46 = vpop.xlane.xlu0 %255 }
 0x1bb   :  { %v258_v47 = vmul.f32 0.03125, %v256_v46 }
 0x1bd   :  { %v2510_v48 = vpop.eup %2509  ;;  %v260_v49 = vadd.f32 1e-05, %v258_v47 }
 0x1be   :  { %v263_v51 = vmul.f32 %v2510_v48, %v247_v29 }
 0x1bf   :  { %2511 = vrsqrt.f32 %v260_v49 }
 0x1c0   :  { %v271_v53 = vmul.f32 %v2186_v50, %v263_v51 }
 0x1c2   :  { %v279_v54 = vadd.f32 %v2187_v52, %v271_v53 }
 0x1c4   :  { %2301 = vmatprep.mubr.msk.f32.mxu1 %vm237_vm1, %v279_v54 }
 0x1c9   :  { %v2512_v55 = vpop.eup %2511 }
 0x1ca   :  { %v264_v56 = vmul.f32 %v2512_v55, %v248_v34 }
 0x1cc   :  { %v272_v57 = vmul.f32 %v2186_v50, %v264_v56 }
 0x1ce   :  { %v280_v58 = vadd.f32 %v2187_v52, %v272_v57 }
 0x1d0   :  { %2302 = vmatmul.mubr.msk.f32.vlgmr.msra.gmra.mrb[0].mxu1 %vm237_vm1, %v280_v58 }
 0x1d1   :  { %2306 = vmatprep.mubr.msk.f32.mxu1 %vm2581_vm2, %v2580_v59 }
 0x2a3   :  { %v2303_v61 = vpop.f32.mrb[0].mxu1 }
 0x2a4   :  { %v2739_v62 = vadd.f32 %v2303_v61, %v2188_v60  ;;  %v364_v63 = vpop.f32.mrb[1].mxu1 }
 0x2a5   :  { %v2741_v0 = vadd.f32 %v2188_v60, %v364_v63 }
 0x2a6   :  { %377 = vrot.lane.b32.xlu0 %v2739_v62, %s2582_s3 }
 0x2a7   :  { %375 = vrot.lane.b32.xlu1 %v2741_v0, %s2582_s3 }
 0x2aa   :  { %383 = vrot.lane.b32.xlu0 %v2741_v0, %s2583_s15 }
 0x2ab   :  { %379 = vrot.lane.b32.xlu1 %v2741_v0, %s2584_s5 }
 0x2ae   :  { %388 = vrot.lane.b32.xlu0 %v2741_v0, %s2578_s18 }
 0x2af   :  { %381 = vrot.lane.b32.xlu1 %v2739_v62, %s2584_s5 }
 0x2b3   :  { %385 = vrot.lane.b32.xlu1 %v2739_v62, %s2583_s15 }
 0x2b7   :  { %465 = vrot.lane.b32.xlu1 %v2739_v62, %s2578_s18 }
 0x318   :  { %v2753_v1 = vpop.permute.xlu0 %377 }
 0x319   :  { %617 = vrot.lane.b32.xlu1 %v2753_v1, %s2578_s18  ;;  %v2757_v2 = vpop.permute.xlu1 %375 }
 0x31a   :  { %541 = vrot.lane.b32.xlu0 %v2757_v2, %s2578_s18 }
 0x31c   :  { %v2761_v3 = vpop.permute.xlu0 %383 }
 0x31d   :  { %v2763_v4 = vpop.permute.xlu1 %379 }
 0x31e   :  { %693 = vrot.lane.b32.xlu0 %v2763_v4, %s2578_s18 }
 0x320   :  { %v389_v5 = vpop.permute.xlu0 %388 }
 0x321   :  { %2305 = vmatpush3.xpose.msk.msra.mxu1 %vm390_vm3, %v389_v5  ;;  %v2768_v6 = vpop.permute.xlu1 %381 }
 0x322   :  { %845 = vrot.lane.b32.xlu0 %v2761_v3, %s2578_s18  ;;  %769 = vrot.lane.b32.xlu1 %v2768_v6, %s2578_s18 }
 0x323   :  { %2309 = vmatprep.subr.mxu1 %v2580_v59 }
 0x324   :  { %2307 = vmatmul.mubr.msk.f32.vlgmr.msra.gmra.mrb[2].mxu1 %vm390_vm3, %v2741_v0 }
 0x325   :  { %v2777_v7 = vpop.permute.xlu1 %385  ;;  %2311 = vmatprep.mubr.msk.f32.mxu1 %vm2581_vm2, %v2580_v59 }
 0x326   :  { %921 = vrot.lane.b32.xlu1 %v2777_v7, %s2578_s18 }
 0x329   :  { %v466_v8 = vpop.permute.xlu1 %465 }
 0x32a   :  { %2310 = vmatpush3.xpose.msk.msra.mxu1 %vm390_vm3, %v466_v8 }
 0x32b   :  { %2319 = vmatprep.subr.mxu1 %v2580_v59 }
 0x32d   :  { %2312 = vmatmul.mubr.msk.f32.vlgmr.msra.gmra.mrb[4].mxu1 %vm390_vm3, %v2739_v62 }
 0x32e   :  { %2321 = vmatprep.mubr.msk.f32.mxu1 %vm2581_vm2, %v2580_v59 }
 0x38b   :  { %v618_v9 = vpop.permute.xlu1 %617 }
 0x38c   :  { %v542_v10 = vpop.permute.xlu0 %541  ;;  %2320 = vmatpush3.xpose.msk.msra.mxu1 %vm390_vm3, %v618_v9 }
 0x38d   :  { %2315 = vmatpush3.xpose.msk.msra.mxu0 %vm390_vm3, %v542_v10  ;;  %2329 = vmatprep.subr.mxu1 %v2580_v59 }
 0x38e   :  { %2324 = vmatprep.subr.mxu0 %v2580_v59 }
 0x38f   :  { %2322 = vmatmul.mubr.msk.f32.vlgmr.msra.gmra.mrb[6].mxu1 %vm390_vm3, %v2753_v1 }
 0x390   :  { %2317 = vmatmul.mubr.msk.f32.vlgmr.msra.gmra.mrb[0].mxu0 %vm390_vm3, %v2757_v2  ;;  %v694_v11 = vpop.permute.xlu0 %693  ;;  %2331 = vmatprep.mubr.msk.f32.mxu1 %vm2581_vm2, %v2580_v59 }
 0x391   :  { %2325 = vmatpush3.xpose.msk.msra.mxu0 %vm390_vm3, %v694_v11  ;;  %2326 = vmatprep.mubr.msk.f32.mxu0 %vm2581_vm2, %v2580_v59 }
 0x392   :  { %2334 = vmatprep.subr.mxu0 %v2580_v59 }
 0x394   :  { %2327 = vmatmul.mubr.msk.f32.vlgmr.msra.gmra.mrb[2].mxu0 %vm390_vm3, %v2763_v4  ;;  %v846_v12 = vpop.permute.xlu0 %845  ;;  %v770_v13 = vpop.permute.xlu1 %769 }
 0x395   :  { %2330 = vmatpush3.xpose.msk.msra.mxu1 %vm390_vm3, %v770_v13  ;;  %2335 = vmatpush3.xpose.msk.msra.mxu0 %vm390_vm3, %v846_v12 }
 0x396   :  { %2336 = vmatprep.mubr.msk.f32.mxu0 %vm2581_vm2, %v2580_v59  ;;  %2339 = vmatprep.subr.mxu1 %v2580_v59 }
 0x397   :  { %2344 = vmatprep.subr.mxu0 %v2580_v59 }
 0x398   :  { %2332 = vmatmul.mubr.msk.f32.vlgmr.msra.gmra.mrb[8].mxu1 %vm390_vm3, %v2768_v6  ;;  %2337 = vmatmul.mubr.msk.f32.vlgmr.msra.gmra.mrb[4].mxu0 %vm390_vm3, %v2761_v3  ;;  %v922_v14 = vpop.permute.xlu1 %921 }
 0x399   :  { %2340 = vmatpush3.xpose.msk.msra.mxu1 %vm390_vm3, %v922_v14  ;;  %2341 = vmatprep.mubr.msk.f32.mxu1 %vm2581_vm2, %v2580_v59 }
 0x39a   :  { %2349 = vmatprep.subr.mxu1 %v2580_v59  ;;  %2346 = vmatprep.mubr.msk.f32.mxu0 %vm2581_vm2, %v2580_v59 }
 0x39c   :  { %2342 = vmatmul.mubr.msk.f32.vlgmr.msra.gmra.mrb[10].mxu1 %vm390_vm3, %v2777_v7 }
 0x39d   :  { %2351 = vmatprep.mubr.msk.f32.mxu1 %vm2581_vm2, %v2580_v59 }
 0x3f7   :  { %v461_v16 = vpop.f32.mrb[2].mxu1 }
 0x3f8   :  { %v462_v17 = vadd.f32 %v461_v16, %v387_v15  ;;  %v2308_v18 = vpop.f32.mrb[3].mxu1 }
 0x3fa   :  { %v997_v19 = vsel %vm390_vm3, %v462_v17, -inf }
 0x3fb   :  { %998 = vmax.xlane.f32.xlu0 %v997_v19 }
 0x400   :  { %v537_v20 = vpop.f32.mrb[4].mxu1 }
 0x401   :  { %v538_v22 = vadd.f32 %v537_v20, %v387_v15  ;;  %v2313_v23 = vpop.f32.mrb[5].mxu1 }
 0x403   :  { %v1000_v24 = vsel %vm390_vm3, %v538_v22, -inf }
 0x404   :  { %1001 = vmax.xlane.f32.xlu1 %v1000_v24 }
 0x462   :  { %v689_v26 = vpop.f32.mrb[6].mxu1 }
 0x463   :  { %v613_v27 = vpop.f32.mrb[0].mxu0  ;;  %v2323_v28 = vpop.f32.mrb[7].mxu1  ;;  %v690_v31 = vadd.f32 %v689_v26, %v387_v15 }
 0x464   :  { %v614_v29 = vadd.f32 %v613_v27, %v387_v15  ;;  %v2318_v30 = vpop.f32.mrb[1].mxu0 }
 0x465   :  { %v1006_v37 = vsel %vm390_vm3, %v690_v31, -inf }
 0x466   :  { %v1003_v32 = vsel %vm390_vm3, %v614_v29, -inf }
 0x467   :  { %1004 = vmax.xlane.f32.xlu0 %v1003_v32  ;;  %v765_v33 = vpop.f32.mrb[2].mxu0 }
 0x468   :  { %v766_v34 = vadd.f32 %v765_v33, %v387_v15  ;;  %v2328_v35 = vpop.f32.mrb[3].mxu0 }
 0x46a   :  { %v1009_v36 = vsel %vm390_vm3, %v766_v34, -inf }
 0x46b   :  { %v917_v38 = vpop.f32.mrb[4].mxu0  ;;  %1010 = vmax.xlane.f32.xlu1 %v1009_v36  ;;  %1007 = vmax.xlane.f32.xlu0 %v1006_v37  ;;  %v841_v39 = vpop.f32.mrb[8].mxu1 }
 0x46c   :  { %v918_v40 = vadd.f32 %v917_v38, %v387_v15  ;;  %v842_v41 = vadd.f32 %v841_v39, %v387_v15  ;;  %v2333_v42 = vpop.f32.mrb[9].mxu1  ;;  %v2338_v43 = vpop.f32.mrb[5].mxu0 }
 0x46e   :  { %v1015_v44 = vsel %vm390_vm3, %v918_v40, -inf  ;;  %v1012_v45 = vsel %vm390_vm3, %v842_v41, -inf }
 0x46f   :  { %1016 = vmax.xlane.f32.xlu1 %v1015_v44  ;;  %1013 = vmax.xlane.f32.xlu0 %v1012_v45  ;;  %v993_v46 = vpop.f32.mrb[10].mxu1 }
 0x470   :  { %v994_v47 = vadd.f32 %v993_v46, %v387_v15  ;;  %v2343_v48 = vpop.f32.mrb[11].mxu1 }
 0x472   :  { %v1018_v49 = vsel %vm390_vm3, %v994_v47, -inf }
 0x473   :  { %1019 = vmax.xlane.f32.xlu0 %v1018_v49 }
 0x480   :  { %1085 = vrot.lane.b32.xlu1 %v2741_v0, %s2579_s0 }
 0x484   :  { %1237 = vrot.lane.b32.xlu1 %v2757_v2, %s2579_s0 }
 0x488   :  { %1313 = vrot.lane.b32.xlu1 %v2753_v1, %s2579_s0  ;;  %v999_v52 = vpop.xlane.xlu0 %998 }
 0x489   :  { %1161 = vrot.lane.b32.xlu0 %v2739_v62, %s2579_s0  ;;  %v1021_v53 = vsub.f32 %v462_v17, %v999_v52 }
 0x48b   :  { %v1029_v55 = vmul.f32 1.442695, %v1021_v53 }
 0x48c   :  { %1465 = vrot.lane.b32.xlu1 %v2768_v6, %s2579_s0 }
 0x48d   :  { %1389 = vrot.lane.b32.xlu0 %v2763_v4, %s2579_s0 }
 0x491   :  { %v1002_v50 = vpop.xlane.xlu1 %1001 }
 0x492   :  { %v1022_v51 = vsub.f32 %v538_v22, %v1002_v50 }
 0x494   :  { %v1031_v54 = vmul.f32 1.442695, %v1022_v51 }
 0x496   :  { %2513 = vpow2.f32 %v1031_v54 }
 0x497   :  { %2515 = vpow2.f32 %v1029_v55 }
 0x4a0   :  { %v2848_v56 = vpop.eup %2513 }
 0x4a1   :  { %v1048_v57 = vsel %vm390_vm3, %v2848_v56, 0.0  ;;  %v2852_v58 = vpop.eup %2515 }
 0x4a2   :  { %v1045_v60 = vsel %vm390_vm3, %v2852_v58, 0.0 }
 0x4ac   :  { %1049 = vadd.xlane.f32.xlu0 %v1048_v57 }
 0x4b0   :  { %1046 = vadd.xlane.f32.xlu1 %v1045_v60 }
 0x4f4   :  { %v1005_v61 = vpop.xlane.xlu0 %1004 }
 0x4f5   :  { %v1023_v62 = vsub.f32 %v614_v29, %v1005_v61 }
 0x4f7   :  { %v1033_v63 = vmul.f32 1.442695, %v1023_v62 }
 0x4f8   :  { %v1008_v0 = vpop.xlane.xlu0 %1007  ;;  %v1011_v1 = vpop.xlane.xlu1 %1010 }
 0x4f9   :  { %2517 = vpow2.f32 %v1033_v63  ;;  %v1024_v2 = vsub.f32 %v690_v31, %v1008_v0  ;;  %v1025_v4 = vsub.f32 %v766_v34, %v1011_v1 }
 0x4fb   :  { %v1035_v5 = vmul.f32 1.442695, %v1024_v2  ;;  %v1037_v6 = vmul.f32 1.442695, %v1025_v4  ;;  %v1725_v2 = vld [vmem:[%s3043_s6] sm:$0xff]  ;;  %v1726_v4 = vld [vmem:[%s3043_s6 + $0x8] sm:$0xff] }
 0x4fc   :  { %v1014_v8 = vpop.xlane.xlu0 %1013  ;;  %v1017_v9 = vpop.xlane.xlu1 %1016 }
 0x4fd   :  { %2519 = vpow2.f32 %v1035_v5  ;;  %v1026_v10 = vsub.f32 %v842_v41, %v1014_v8  ;;  %v1027_v11 = vsub.f32 %v918_v40, %v1017_v9  ;;  %v2449_v5 = vpack.c.bf16 %v1726_v4, %v1725_v2  ;;  %v2218_v4 = vld [vmem:[%s3045_s8] ss:$0 sm:$0xff] }
 0x4fe   :  { %2521 = vpow2.f32 %v1037_v6  ;;  %v1728_v6 = vld [vmem:[%s3043_s6 + $0x18] sm:$0xff] }
 0x4ff   :  { %v1039_v12 = vmul.f32 1.442695, %v1026_v10  ;;  %v1041_v13 = vmul.f32 1.442695, %v1027_v11 }
 0x500   :  { %v1020_v14 = vpop.xlane.xlu0 %1019  ;;  %v1086_v15 = vpop.permute.xlu1 %1085 }
 0x501   :  { %2523 = vpow2.f32 %v1039_v12  ;;  %v1028_v16 = vsub.f32 %v994_v47, %v1020_v14  ;;  %2345 = vmatpush3.msra.mxu0 %v1086_v15 }
 0x502   :  { %2525 = vpow2.f32 %v1041_v13  ;;  %2354 = vmatprep.subr.mxu0 %v2580_v59 }
 0x503   :  { %v2518_v17 = vpop.eup %2517  ;;  %v1043_v18 = vmul.f32 1.442695, %v1028_v16 }
 0x504   :  { %v1162_v19 = vpop.permute.xlu0 %1161  ;;  %v1051_v20 = vsel %vm390_vm3, %v2518_v17, 0.0  ;;  %v1238_v33 = vpop.permute.xlu1 %1237 }
 0x505   :  { %2527 = vpow2.f32 %v1043_v18  ;;  %1052 = vadd.xlane.f32.xlu1 %v1051_v20  ;;  %2350 = vmatpush3.msra.mxu1 %v1162_v19 }
 0x506   :  { %2359 = vmatprep.subr.mxu1 %v2580_v59 }
 0x507   :  { %v2520_v22 = vpop.eup %2519 }
 0x508   :  { %v2522_v23 = vpop.eup %2521  ;;  %v1054_v24 = vsel %vm390_vm3, %v2520_v22, 0.0  ;;  %v1314_v34 = vpop.permute.xlu1 %1313 }
 0x509   :  { %1055 = vadd.xlane.f32.xlu0 %v1054_v24  ;;  %v1057_v26 = vsel %vm390_vm3, %v2522_v23, 0.0  ;;  %v1390_v35 = vpop.permute.xlu0 %1389 }
 0x50a   :  { %1058 = vadd.xlane.f32.xlu1 %v1057_v26 }
 0x50b   :  { %v2524_v27 = vpop.eup %2523 }
 0x50c   :  { %v2526_v28 = vpop.eup %2525  ;;  %v1060_v29 = vsel %vm390_vm3, %v2524_v27, 0.0  ;;  %v1466_v36 = vpop.permute.xlu1 %1465 }
 0x50d   :  { %1061 = vadd.xlane.f32.xlu0 %v1060_v29  ;;  %v1063_v30 = vsel %vm390_vm3, %v2526_v28, 0.0 }
 0x50e   :  { %1064 = vadd.xlane.f32.xlu1 %v1063_v30 }
 0x50f   :  { %v2863_v31 = vpop.eup %2527 }
 0x510   :  { %v1066_v32 = vsel %vm390_vm3, %v2863_v31, 0.0 }
 0x511   :  { %1067 = vadd.xlane.f32.xlu0 %v1066_v32 }
 0x51f   :  { %1617 = vrot.lane.b32.xlu1 %v2777_v7, %s2579_s0 }
 0x527   :  { %1541 = vrot.lane.b32.xlu0 %v2761_v3, %s2579_s0 }
 0x539   :  { %v1050_v37 = vpop.xlane.xlu0 %1049 }
 0x53a   :  { %2529 = vrcp.f32 %v1050_v37 }
 0x53d   :  { %v1047_v38 = vpop.xlane.xlu1 %1046 }
 0x53e   :  { %2531 = vrcp.f32 %v1047_v38 }
 0x544   :  { %v2530_v39 = vpop.eup %2529 }
 0x545   :  { %v1078_v40 = vmul.f32 %v2530_v39, %v2848_v56 }
 0x547   :  { %2352 = vmatmul.mubr.msk.f32.vlgmr.msra.gmra.mrb[12].mxu1 %vm390_vm3, %v1078_v40 }
 0x548   :  { %v2532_v41 = vpop.eup %2531  ;;  %2360 = vmatpush3.msra.mxu1 %v1314_v34  ;;  %2361 = vmatprep.mubr.msk.f32.mxu1 %vm2581_vm2, %v2580_v59 }
 0x549   :  { %v1077_v3 = vmul.f32 %v2532_v41, %v2852_v58  ;;  %2369 = vmatprep.subr.mxu1 %v2580_v59 }
 0x54b   :  { %2347 = vmatmul.mubr.msk.f32.vlgmr.msra.gmra.mrb[6].mxu0 %vm390_vm3, %v1077_v3 }
 0x54c   :  { %2355 = vmatpush3.msra.mxu0 %v1238_v33  ;;  %2356 = vmatprep.mubr.msk.f32.mxu0 %vm2581_vm2, %v2580_v59 }
 0x54d   :  { %2364 = vmatprep.subr.mxu0 %v2580_v59 }
 0x592   :  { %v1053_v7 = vpop.xlane.xlu1 %1052 }
 0x593   :  { %2533 = vrcp.f32 %v1053_v7 }
 0x596   :  { %v1056_v42 = vpop.xlane.xlu0 %1055 }
 0x597   :  { %2535 = vrcp.f32 %v1056_v42  ;;  %v1059_v43 = vpop.xlane.xlu1 %1058 }
 0x598   :  { %2537 = vrcp.f32 %v1059_v43 }
 0x59a   :  { %v1062_v44 = vpop.xlane.xlu0 %1061 }
 0x59b   :  { %2539 = vrcp.f32 %v1062_v44  ;;  %v1065_v45 = vpop.xlane.xlu1 %1064 }
 0x59c   :  { %2541 = vrcp.f32 %v1065_v45 }
 0x59d   :  { %v2534_v46 = vpop.eup %2533 }
 0x59e   :  { %v1079_v47 = vmul.f32 %v2534_v46, %v2518_v17  ;;  %v1068_v48 = vpop.xlane.xlu0 %1067 }
 0x59f   :  { %2543 = vrcp.f32 %v1068_v48  ;;  %v1618_v58 = vpop.permute.xlu1 %1617 }
 0x5a0   :  { %2357 = vmatmul.mubr.msk.f32.vlgmr.msra.gmra.mrb[8].mxu0 %vm390_vm3, %v1079_v47 }
 0x5a1   :  { %v2536_v49 = vpop.eup %2535  ;;  %2365 = vmatpush3.msra.mxu0 %v1390_v35  ;;  %2366 = vmatprep.mubr.msk.f32.mxu0 %vm2581_vm2, %v2580_v59  ;;  %v2215_v35 = vld [vmem:[%s3044_s7] ss:$0 sm:$0xff] }
 0x5a2   :  { %v2538_v50 = vpop.eup %2537  ;;  %v1080_v51 = vmul.f32 %v2536_v49, %v2520_v22  ;;  %2374 = vmatprep.subr.mxu0 %v2580_v59  ;;  %v1542_v53 = vpop.permute.xlu0 %1541 }
 0x5a3   :  { %v1081_v52 = vmul.f32 %v2538_v50, %v2522_v23  ;;  %v1863_v50 = vld [vmem:[%s3047_s10] sm:$0xff] }
 0x5a4   :  { %2362 = vmatmul.mubr.msk.f32.vlgmr.msra.gmra.mrb[14].mxu1 %vm390_vm3, %v1080_v51  ;;  %v1864_v51 = vld [vmem:[%s3047_s10 + $0x8] sm:$0xff] }
 0x5a5   :  { %v2540_v54 = vpop.eup %2539  ;;  %2367 = vmatmul.mubr.msk.f32.vlgmr.msra.gmra.mrb[10].mxu0 %vm390_vm3, %v1081_v52  ;;  %2370 = vmatpush3.msra.mxu1 %v1466_v36  ;;  %v2457_v52 = vpack.c.bf16 %v1864_v51, %v1863_v50 }
 0x5a6   :  { %v2542_v55 = vpop.eup %2541  ;;  %v1082_v56 = vmul.f32 %v2540_v54, %v2524_v27  ;;  %2375 = vmatpush3.msra.mxu0 %v1542_v53  ;;  %2371 = vmatprep.mubr.msk.f32.mxu1 %vm2581_vm2, %v2580_v59  ;;  %v1865_v53 = vld [vmem:[%s3047_s10 + $0x10] sm:$0xff]  ;;  %v1866_v54 = vld [vmem:[%s3047_s10 + $0x18] sm:$0xff] }
 0x5a7   :  { %v1083_v57 = vmul.f32 %v2542_v55, %v2526_v28  ;;  %2376 = vmatprep.mubr.msk.f32.mxu0 %vm2581_vm2, %v2580_v59  ;;  %2379 = vmatprep.subr.mxu1 %v2580_v59  ;;  %v2461_v55 = vpack.c.bf16 %v1866_v54, %v1865_v53 }
 0x5a8   :  { %2372 = vmatmul.mubr.msk.f32.vlgmr.msra.gmra.mrb[16].mxu1 %vm390_vm3, %v1082_v56  ;;  %v1973_v56 = vld [vmem:[%s3049_s12] sm:$0xff] }
 0x5a9   :  { %v2544_v60 = vpop.eup %2543  ;;  %2377 = vmatmul.mubr.msk.f32.vlgmr.msra.gmra.mrb[12].mxu0 %vm390_vm3, %v1083_v57  ;;  %2380 = vmatpush3.msra.mxu1 %v1618_v58  ;;  %v1974_v57 = vld [vmem:[%s3049_s12 + $0x8] sm:$0xff] }
 0x5aa   :  { %v1084_v61 = vmul.f32 %v2544_v60, %v2863_v31  ;;  %2381 = vmatprep.mubr.msk.f32.mxu1 %vm2581_vm2, %v2580_v59  ;;  %2450 = vmatprep.subr.bf16.mxu1 %v2449_v5  ;;  %v1727_v59 = vld [vmem:[%s3043_s6 + $0x10] sm:$0xff]  ;;  %v2465_v58 = vpack.c.bf16 %v1974_v57, %v1973_v56  ;;  %v2223_v57 = vld [vmem:[%s3050_s13] ss:$0 sm:$0xff]  ;;  %s2588_s13 = smov [#allocation3]  }
 0x5ab   :  { %v2453_v8 = vpack.c.bf16 %v1728_v6, %v1727_v59  ;;  %v2219_v59 = vld [vmem:[%s3046_s9] ss:$0 sm:$0xff] }
 0x5ac   :  { %2382 = vmatmul.mubr.msk.f32.vlgmr.msra.gmra.mrb[18].mxu1 %vm390_vm3, %v1084_v61  ;;  %2466 = vmatprep.subr.bf16.mxu0 %v2465_v58 }
 0x5ad   :  { %2452 = vmatpush3.bf16.msra.mxu1 %v2449_v5  ;;  %2468 = vmatpush3.bf16.msra.mxu0 %v2465_v58 }
 0x5ae   :  { %2454 = vmatprep.subr.bf16.mxu1 %v2453_v8 }
 0x5b1   :  { %2456 = vmatpush3.bf16.msra.mxu1 %v2453_v8 }
 0x5b2   :  { %2458 = vmatprep.subr.bf16.mxu1 %v2457_v52 }
 0x61a   :  { %v1233_v62 = vpop.f32.mrb[12].mxu1 }
 0x61b   :  { %v2353_v63 = vpop.f32.mrb[13].mxu1 }
 0x61e   :  { %v1157_v0 = vpop.f32.mrb[6].mxu0 }
 0x61f   :  { %v2348_v1 = vpop.f32.mrb[7].mxu0 }
 0x673   :  { %v1309_v9 = vpop.f32.mrb[8].mxu0 }
 0x674   :  { %1695 = vrot.lane.b32.xlu0 %v1309_v9, %s2585_s27  ;;  %v2358_v10 = vpop.f32.mrb[9].mxu0 }
 0x677   :  { %v1385_v11 = vpop.f32.mrb[14].mxu1 }
 0x678   :  { %v1461_v12 = vpop.f32.mrb[10].mxu0  ;;  %1697 = vrot.lane.b32.xlu1 %v1385_v11, %s2585_s27  ;;  %v2363_v13 = vpop.f32.mrb[15].mxu1 }
 0x679   :  { %1703 = vrot.lane.b32.xlu0 %v1461_v12, %s2586_s28  ;;  %v2368_v14 = vpop.f32.mrb[11].mxu0  ;;  %v1975_v13 = vld [vmem:[%s3049_s12 + $0x10] sm:$0xff] }
 0x67a   :  { %v1976_v14 = vld [vmem:[%s3049_s12 + $0x18] sm:$0xff] }
 0x67b   :  { %v1537_v15 = vpop.f32.mrb[16].mxu1 }
 0x67c   :  { %v1613_v16 = vpop.f32.mrb[12].mxu0  ;;  %1705 = vrot.lane.b32.xlu1 %v1537_v15, %s2586_s28  ;;  %v2373_v17 = vpop.f32.mrb[17].mxu1  ;;  %v2469_v15 = vpack.c.bf16 %v1976_v14, %v1975_v13 }
 0x67d   :  { %1711 = vrot.lane.b32.xlu0 %v1613_v16, %s2587_s29  ;;  %v2378_v18 = vpop.f32.mrb[13].mxu0  ;;  %v1977_v16 = vld [vmem:[%s3049_s12 + $0x20] sm:$0xff]  ;;  %v1978_v17 = vld [vmem:[%s3049_s12 + $0x28] sm:$0xff] }
 0x67e   :  { %2470 = vmatprep.subr.bf16.mxu0 %v2469_v15  ;;  %v2473_v18 = vpack.c.bf16 %v1978_v17, %v1977_v16 }
 0x67f   :  { %v1689_v19 = vpop.f32.mrb[18].mxu1  ;;  %2472 = vmatpush3.bf16.msra.mxu0 %v2469_v15 }
 0x680   :  { %1713 = vrot.lane.b32.xlu1 %v1689_v19, %s2587_s29  ;;  %v2383_v20 = vpop.f32.mrb[19].mxu1  ;;  %2474 = vmatprep.subr.bf16.mxu0 %v2473_v18  ;;  %v1979_v19 = vld [vmem:[%s3049_s12 + $0x30] sm:$0xff] }
 0x681   :  { %v1980_v20 = vld [vmem:[%s3049_s12 + $0x38] sm:$0xff] }
 0x683   :  { %2476 = vmatpush3.bf16.msra.mxu0 %v2473_v18 }
 0x6e6   :  { %v1696_v22 = vpop.permute.xlu0 %1695 }
 0x6e7   :  { %v1717_v26 = vsel %vm390_vm3, %v1157_v0, %v1696_v22  ;;  %v1981_v22 = vld [vmem:[%s3049_s12 + $0x40] sm:$0xff] }
 0x6ea   :  { %v1698_v23 = vpop.permute.xlu1 %1697 }
 0x6eb   :  { %v1704_v24 = vpop.permute.xlu0 %1703  ;;  %v1718_v31 = vsel %vm390_vm3, %v1233_v62, %v1698_v23  ;;  %v2477_v23 = vpack.c.bf16 %v1980_v20, %v1979_v19 }
 0x6ec   :  { %v1720_v28 = vsel %vm1719_vm4, %v1717_v26, %v1704_v24  ;;  %v1982_v24 = vld [vmem:[%s3049_s12 + $0x48] sm:$0xff] }
 0x6ed   :  { %v2481_v26 = vpack.c.bf16 %v1982_v24, %v1981_v22  ;;  %2478 = vmatprep.subr.bf16.mxu0 %v2477_v23 }
 0x6ee   :  { %v1706_v27 = vpop.permute.xlu1 %1705  ;;  %2480 = vmatpush3.bf16.msra.mxu0 %v2477_v23 }
 0x6ef   :  { %v1712_v29 = vpop.permute.xlu0 %1711  ;;  %v1721_v32 = vsel %vm1719_vm4, %v1718_v31, %v1706_v27  ;;  %v1983_v27 = vld [vmem:[%s3049_s12 + $0x50] sm:$0xff]  ;;  %2482 = vmatprep.subr.bf16.mxu0 %v2481_v26  ;;  %v1986_v31 = vld [vmem:[%s3049_s12 + $0x68] sm:$0xff] }
 0x6f0   :  { %v1723_v30 = vsel %vm1722_vm5, %v1720_v28, %v1712_v29  ;;  %v1984_v28 = vld [vmem:[%s3049_s12 + $0x58] sm:$0xff] }
 0x6f1   :  { %2392 = vmatprep.mubr.msk.f32.mxu1 %vm237_vm1, %v1723_v30  ;;  %v2485_v29 = vpack.c.bf16 %v1984_v28, %v1983_v27  ;;  %v1985_v30 = vld [vmem:[%s3049_s12 + $0x60] sm:$0xff] }
 0x6f2   :  { %v1714_v33 = vpop.permute.xlu1 %1713  ;;  %2484 = vmatpush3.bf16.msra.mxu0 %v2481_v26 }
 0x6f3   :  { %v1724_v34 = vsel %vm1722_vm5, %v1721_v32, %v1714_v33  ;;  %2486 = vmatprep.subr.bf16.mxu0 %v2485_v29  ;;  %v2489_v32 = vpack.c.bf16 %v1986_v31, %v1985_v30  ;;  %v1987_v33 = vld [vmem:[%s3049_s12 + $0x70] sm:$0xff] }
 0x6f4   :  { %2393 = vmatmul.mubr.msk.f32.vlgmr.msra.gmra.mrb[20].mxu1 %vm237_vm1, %v1724_v34  ;;  %v1988_v34 = vld [vmem:[%s3049_s12 + $0x78] sm:$0xff] }
 0x6f5   :  { %2460 = vmatpush3.bf16.msra.mxu1 %v2457_v52 }
 0x6f6   :  { %2462 = vmatprep.subr.bf16.mxu1 %v2461_v55  ;;  %2488 = vmatpush3.bf16.msra.mxu0 %v2485_v29 }
 0x6f7   :  { %2490 = vmatprep.subr.bf16.mxu0 %v2489_v32 }
 0x6f9   :  { %2464 = vmatpush3.bf16.msra.mxu1 %v2461_v55 }
 0x6fa   :  { %2492 = vmatpush3.bf16.msra.mxu0 %v2489_v32 }
 0x7c7   :  { %v2394_v36 = vpop.f32.mrb[20].mxu1 }
 0x7c8   :  { %v1814_v37 = vadd.f32 %v2394_v36, %v2215_v35  ;;  %v1808_v38 = vpop.f32.mrb[21].mxu1  ;;  %v2220_v36 = vld [vmem:[%s3048_s11] ss:$0 sm:$0xff] }
 0x7c9   :  { %v1809_v39 = vadd.f32 %v2215_v35, %v1808_v38  ;;  %v2493_v35 = vpack.c.bf16 %v1988_v34, %v1987_v33 }
 0x7ca   :  { %v2918_v40 = vadd.f32 %v1814_v37, %v2702_v25 }
 0x7cb   :  { %v2921_v41 = vadd.f32 %v1809_v39, %v2694_v21  ;;  %2494 = vmatprep.subr.bf16.mxu0 %v2493_v35 }
 0x7cc   :  { %v1824_v3 = vsel %vm237_vm1, %v2918_v40, 0.0  ;;  %2496 = vmatpush3.bf16.msra.mxu0 %v2493_v35 }
 0x7cd   :  { %1825 = vadd.xlane.f32.xlu1 %v1824_v3  ;;  %v1821_v7 = vsel %vm237_vm1, %v2921_v41, 0.0 }
 0x7ce   :  { %1822 = vadd.xlane.f32.xlu0 %v1821_v7 }
 0x85a   :  { %v1826_v42 = vpop.xlane.xlu1 %1825 }
 0x85b   :  { %v1828_v43 = vmul.f32 0.03125, %v1826_v42  ;;  %v1823_v44 = vpop.xlane.xlu0 %1822 }
 0x85c   :  { %v1827_v45 = vmul.f32 0.03125, %v1823_v44 }
 0x85d   :  { %v1830_v46 = vsub.f32 %v2918_v40, %v1828_v43 }
 0x85e   :  { %v1829_v25 = vsub.f32 %v2921_v41, %v1827_v45 }
 0x85f   :  { %v1832_v48 = vmul.f32 %v1830_v46, %v1830_v46 }
 0x860   :  { %v1831_v47 = vmul.f32 %v1829_v25, %v1829_v25 }
 0x861   :  { %v1836_v49 = vsel %vm237_vm1, %v1832_v48, 0.0 }
 0x862   :  { %v1833_v21 = vsel %vm237_vm1, %v1831_v47, 0.0 }
 0x863   :  { %1834 = vadd.xlane.f32.xlu0 %v1833_v21 }
 0x867   :  { %1837 = vadd.xlane.f32.xlu0 %v1836_v49 }
 0x8f0   :  { %v1835_v60 = vpop.xlane.xlu0 %1834 }
 0x8f1   :  { %v1839_v61 = vmul.f32 0.03125, %v1835_v60 }
 0x8f3   :  { %v1841_v62 = vadd.f32 1e-05, %v1839_v61 }
 0x8f4   :  { %v1838_v63 = vpop.xlane.xlu0 %1837 }
 0x8f5   :  { %2545 = vrsqrt.f32 %v1841_v62  ;;  %v1840_v0 = vmul.f32 0.03125, %v1838_v63 }
 0x8f7   :  { %v1842_v1 = vadd.f32 1e-05, %v1840_v0 }
 0x8f9   :  { %2547 = vrsqrt.f32 %v1842_v1 }
 0x8ff   :  { %v2546_v2 = vpop.eup %2545 }
 0x900   :  { %v1845_v5 = vmul.f32 %v2546_v2, %v1829_v25 }
 0x902   :  { %v1853_v6 = vmul.f32 %v2218_v4, %v1845_v5 }
 0x903   :  { %v2548_v8 = vpop.eup %2547 }
 0x904   :  { %v1846_v9 = vmul.f32 %v2548_v8, %v1830_v46  ;;  %v1861_v10 = vadd.f32 %v2219_v59, %v1853_v6 }
 0x906   :  { %v1854_v11 = vmul.f32 %v2218_v4, %v1846_v9  ;;  %2403 = vmatprep.mubr.msk.f32.mxu1 %vm237_vm1, %v1861_v10 }
 0x908   :  { %v1862_v12 = vadd.f32 %v2219_v59, %v1854_v11 }
 0x90a   :  { %2404 = vmatmul.mubr.msk.f32.vlgmr.msra.gmra.mrb[22].mxu1 %vm237_vm1, %v1862_v12 }
 0x9dd   :  { %v2405_v37 = vpop.f32.mrb[22].mxu1 }
 0x9de   :  { %v1952_v38 = vadd.f32 %v2405_v37, %v2220_v36  ;;  %v1946_v39 = vpop.f32.mrb[23].mxu1 }
 0x9df   :  { %v1947_v3 = vadd.f32 %v2220_v36, %v1946_v39 }
 0x9e0   :  { %v1958_v7 = vmul.f32 0.044715, %v1952_v38  ;;  %v1956_v54 = vmul.f32 0.5, %v1952_v38 }
 0x9e1   :  { %v1957_v42 = vmul.f32 0.044715, %v1947_v3  ;;  %v1955_v52 = vmul.f32 0.5, %v1947_v3 }
 0x9e2   :  { %v1960_v43 = vmul.f32 %v1958_v7, %v1952_v38 }
 0x9e3   :  { %v1959_v44 = vmul.f32 %v1957_v42, %v1947_v3 }
 0x9e4   :  { %v1962_v45 = vmul.f32 %v1960_v43, %v1952_v38 }
 0x9e5   :  { %v1961_v46 = vmul.f32 %v1959_v44, %v1947_v3 }
 0x9e6   :  { %v1964_v25 = vadd.f32 %v1962_v45, %v1952_v38 }
 0x9e7   :  { %v1963_v47 = vadd.f32 %v1961_v46, %v1947_v3 }
 0x9e8   :  { %v1966_v21 = vmul.f32 0.7978846, %v1964_v25 }
 0x9e9   :  { %v1965_v48 = vmul.f32 0.7978846, %v1963_v47 }
 0x9ea   :  { %2549 = vtanh.f32 %v1966_v21 }
 0x9eb   :  { %2551 = vtanh.f32 %v1965_v48 }
 0x9f4   :  { %v2550_v49 = vpop.eup %2549 }
 0x9f5   :  { %v2552_v50 = vpop.eup %2551  ;;  %v1970_v51 = vadd.f32 1.0, %v2550_v49 }
 0x9f6   :  { %v1969_v53 = vadd.f32 1.0, %v2552_v50 }
 0x9f7   :  { %v1972_v56 = vmul.f32 %v1970_v51, %v1956_v54 }
 0x9f8   :  { %v1971_v55 = vmul.f32 %v1969_v53, %v1955_v52 }
 0x9fa   :  { %2438 = vmatprep.mubr.f32.mxu0 %v1971_v55 }
 0x9fb   :  { %2439 = vmatmul.mubr.f32.vlgmr.msra.gmra.mrb[14].mxu0 %v1972_v56 }
 0xace   :  { %v2440_v58 = vpop.f32.mrb[14].mxu0 }
 0xacf   :  { %v2068_v60 = vadd.f32 %v2440_v58, %v2223_v57  ;;  %v2062_v61 = vpop.f32.mrb[15].mxu0 }
 0xad0   :  { %v2063_v62 = vadd.f32 %v2223_v57, %v2062_v61 }
 0xad1   :  { %v2072_v63 = vadd.f32 %v2068_v60, %v2918_v40 }
 0xad2   :  { %v2071_v0 = vadd.f32 %v2063_v62, %v2921_v41 }
 0xad3   :  { %2074 = vst.msk [vmem:[#allocation2 + $0x8] sm:$0xff] %vm237_vm1, %v2072_v63 }
 0xad4   :  { %2073 = vst.msk [vmem:[#allocation2] sm:$0xff] %vm237_vm1, %v2071_v0 }
 0xada   :  { %v2086_v1 = vld [vmem:[#allocation2 + $0xd] sm:$0x1]  ;;  %v2078_v2 = vld [vmem:[#allocation2 + $0x9] sm:$0x1]  ;;  %v2082_v4 = vld [vmem:[#allocation2 + $0xb] sm:$0x1] }
 0xadb   :  { %v2085_v5 = vld [vmem:[#allocation2 + $0x5] sm:$0x1]  ;;  %v2125_v59 = vrot.slane %v2086_v1, 7  ;;  %v2077_v6 = vld [vmem:[#allocation2 + $0x1] sm:$0x1]  ;;  %v2099_v8 = vrot.slane %v2078_v2, 7 }
 0xadc   :  { %v2081_v11 = vld [vmem:[#allocation2 + $0x3] sm:$0x1]  ;;  %v2113_v40 = vrot.slane %v2082_v4, 7  ;;  %v2080_v12 = vld [vmem:[#allocation2 + $0xa] sm:$0x1] }
 0xadd   :  { %v2126_v9 = vsel %vm2094_vm6, %v2125_v59, %v2085_v5  ;;  %v2100_v10 = vsel %vm2094_vm6, %v2099_v8, %v2077_v6  ;;  %v2079_v41 = vld [vmem:[#allocation2 + $0x2] sm:$0x1]  ;;  %v2106_v13 = vrot.slane %v2080_v12, 7  ;;  %v2088_v14 = vld [vmem:[#allocation2 + $0xe] sm:$0x1] }
 0xade   :  { %2127 = vrot.lane.b32.xlu0 %v2126_v9, %s2577_s17  ;;  %2101 = vrot.lane.b32.xlu1 %v2100_v10, %s2577_s17  ;;  %v2114_v15 = vsel %vm2094_vm6, %v2113_v40, %v2081_v11  ;;  %v2132_v17 = vrot.slane %v2088_v14, 7  ;;  %v2087_v18 = vld [vmem:[#allocation2 + $0x6] sm:$0x1]  ;;  %v2090_v19 = vld [vmem:[#allocation2 + $0xf] sm:$0x1]  ;;  %s2170_s17 = sshll.u32 %s2588_s13, 4  ;;  %s2171_s17 = int_to_ptr.vmem [resolvable:$true] %s2170_s17 }
 0xadf   :  { %v2107_v16 = vsel %vm2094_vm6, %v2106_v13, %v2079_v41  ;;  %v2139_v22 = vrot.slane %v2090_v19, 7  ;;  %v2089_v23 = vld [vmem:[#allocation2 + $0x7] sm:$0x1]  ;;  %v2076_v27 = vld [vmem:[#allocation2 + $0x8] sm:$0x1]  ;;  %p2558_p1 = scmp.lt.s32.totalorder %s2171_s17, %s2171_s17 }
 0xae0   :  { %v2133_v20 = vsel %vm2094_vm6, %v2132_v17, %v2087_v18  ;;  %v2084_v28 = vld [vmem:[#allocation2 + $0xc] sm:$0x1]  ;;  %v2093_v30 = vrot.slane %v2076_v27, 7  ;;  %v2075_v32 = vld [vmem:[#allocation2] sm:$0x1] }
 0xae1   :  { %v2140_v24 = vsel %vm2094_vm6, %v2139_v22, %v2089_v23  ;;  %v2120_v33 = vrot.slane %v2084_v28, 7  ;;  %v2083_v34 = vld [vmem:[#allocation2 + $0x4] sm:$0x1] }
 0xae2   :  { %2115 = vrot.lane.b32.xlu0 %v2114_v15, %s2578_s18  ;;  %2108 = vrot.lane.b32.xlu1 %v2107_v16, %s2579_s0  ;;  %v2095_v35 = vsel %vm2094_vm6, %v2093_v30, %v2075_v32 }
 0xae3   :  { %v2121_v38 = vsel %vm2094_vm6, %v2120_v33, %v2083_v34 }
 0xae6   :  { %2134 = vrot.lane.b32.xlu1 %v2133_v20, %s2579_s0 }
 0xaea   :  { %2141 = vrot.lane.b32.xlu1 %v2140_v24, %s2578_s18  ;;  %s2553_s18 = scalar_lea.vmem %s2171_s17, 64 }
 0xaeb   :  { %p2554_p0 = scmp.ne.s32.totalorder %s2171_s17, %s2553_s18  ;;  %p2559_p2 = scmp.lt.s32.totalorder %s2553_s18, %s2553_s18 }
 0xaed   :  { %p2560_p3 = por %p2559_p2, %p2558_p1 }
 0xaef   :  { %p2561_p4 = pnand %p2560_p3, %p2554_p0 }
 0xb50   :  { %v2102_v26 = vpop.permute.xlu1 %2101  ;;  %v2128_v29 = vpop.permute.xlu0 %2127 }
 0xb51   :  { %v2144_v37 = vsel %vm237_vm1, %v2095_v35, %v2102_v26  ;;  %v2149_v7 = vsel %vm237_vm1, %v2121_v38, %v2128_v29 }
 0xb54   :  { %v2109_v31 = vpop.permute.xlu1 %2108  ;;  %v2116_v39 = vpop.permute.xlu0 %2115 }
 0xb55   :  { %v2146_v3 = vsel %vm2145_vm7, %v2144_v37, %v2109_v31 }
 0xb56   :  { %v2148_v45 = vsel %vm2147_vm8, %v2146_v3, %v2116_v39 }
 0xb58   :  { %v2135_v36 = vpop.permute.xlu1 %2134 }
 0xb59   :  { %v2150_v42 = vsel %vm2145_vm7, %v2149_v7, %v2135_v36 }
 0xb5c   :  { %v2142_v43 = vpop.permute.xlu1 %2141 }
 0xb5d   :  { %v2151_v44 = vsel %vm2147_vm8, %v2150_v42, %v2142_v43 }
 0xb5e   :  { %v2154_v46 = vcombine.low %v2148_v45, %v2151_v44 }
 0xb60   :  { %2224 = vst.sshfl [vmem:[#allocation3] sm:$0x33 pattern:$0x76325410] %v2154_v46 }
 0xb61   :  { %2564 = shalt.err (!%p2561_p4)
}
 0xb62   :  { %s2565_s30 = scalar_lea.hbm %s3051_s14, 64 }
 0xb63   :  { %p2566_p5 = scmp.ne.s32.totalorder %s3051_s14, %s2565_s30  ;;  %p2569_p6 = scmp.lt.u32.totalorder %s2565_s30, %s3051_s14 }
 0xb65   :  { %p2571_p7 = pnand %p2569_p6, %p2566_p5 }
 0xb67   :  { %2574 = shalt.err (!%p2571_p7)
}
 0xb68   :  { %2173 = dma.vmem_to_hbm [thread:$0]  %s2171_s17, 64, %s3051_s14, [#allocation4]  }
 0xb69   :  { %2575 = dma.done.wait [#allocation4], 64  }
 0xb6a   :  { %2576 = vsyncadd [#allocation4], 4294967232 }
 0xb6b   :  { %2177 = vsyncpa [#allocation4], 1 }

</bundles_post_ra>
